<compile_context>
chip_gen: v6e
topology: v6e:2x2x1
jax: 0.10.0
libtpu: 0.0.40
codegen_flags: <defaults>
</compile_context>

<pallas_src>
import functools

import jax
import jax.numpy as jnp
from jax import lax
from jax.experimental import pallas as pl
from jax.experimental.pallas import tpu as pltpu


def _centers(kernel, kernel_offset):
    if not isinstance(kernel_offset, tuple):
        kernel_offset = (kernel_offset,) * len(kernel)
    cs = []
    for k, off in zip(kernel, kernel_offset):
        if off == "center":
            cs.append((k - 1) // 2)
        elif off == "left":
            cs.append(0)
        elif off == "right":
            cs.append(k - 1)
        else:
            raise ValueError(off)
    return tuple(cs)


def _tree_sum(terms):
    # Pairwise (tree) accumulation for ILP instead of a serial dependent chain.
    while len(terms) > 1:
        nxt = [terms[i] + terms[i + 1] for i in range(0, len(terms) - 1, 2)]
        if len(terms) % 2:
            nxt.append(terms[-1])
        terms = nxt
    return terms[0]


def _group_products(group_taps):
    # All 2**len(group) products of per-tap factors; index = group bits
    # MSB-first (bit==1 -> tap, bit==0 -> 1 - tap).  Shared binary product tree.
    prods = [None]
    for tap in group_taps:
        f0 = 1.0 - tap
        nxt = []
        for p in prods:
            if p is None:
                nxt.extend((f0, tap))
            else:
                nxt.extend((p * f0, p * tap))
        prods = nxt
    return prods


# ----------------------------------------------------------------------------
# Pallas kernel: one grid step == TB batch elements; all recure*layers layer
# applications run inside the kernel on a VMEM-resident sigmoided gate cache.
# ----------------------------------------------------------------------------
def _asic_kernel(x_ref, g_hbm, o_ref, sig_ref, *, kernel, centers, layers, recure):
    k1, k2 = kernel
    c1, c2 = centers
    nk = k1 * k2
    M = 1 << nk
    hi_n = nk // 2            # split the nk gate inputs into two bit groups
    lo_n = nk - hi_n
    n_hi = 1 << hi_n
    n_lo = 1 << lo_n
    TB, D1, D2 = x_ref.shape

    # --- Gates: one DMA + one in-place sigmoid per grid step, hoisted out of
    # the recure*layers*batch-within-block loops.  sigmoid = 0.5*tanh(0.5x)+0.5
    # runs on the EUP slot, so VALU (the bottleneck) is untouched.
    pltpu.sync_copy(g_hbm, sig_ref)
    for layer in range(layers):
        sig_ref[layer] = 0.5 * jnp.tanh(0.5 * sig_ref[layer]) + 0.5

    # Factor trick (tap / 1-tap) needs state in [0,1]; valid inputs already are.
    state = jnp.clip(x_ref[...], 0.0, 1.0)            # (TB, D1, D2)

    full_layer_load = M <= 32   # small M: load the whole layer slab once

    def apply_layer(state, layer):
        # Circularly shifted taps, tap index t = i1*k2 + i2 (torch reshape
        # order in convolve()).  One lane-axis roll per i2; i1 variants are
        # sublane rolls of that base; identity rolls skipped.
        taps = [None] * nk
        for i2 in range(k2):
            s2 = (c2 - i2) % D2
            base = jnp.roll(state, s2, axis=2) if s2 else state
            for i1 in range(k1):
                s1 = (c1 - i1) % D1
                taps[i1 * k2 + i2] = jnp.roll(base, s1, axis=1) if s1 else base

        hi_prod = _group_products(taps[:hi_n])         # len n_hi (MSB bits of m)
        lo_prod = _group_products(taps[hi_n:])         # len n_lo (LSB bits of m)

        if full_layer_load:
            g = sig_ref[layer]                         # (M, D1, D2)

        # state' = sum_a hi[a] * ( sum_b gate[a*n_lo + b] * lo[b] ),  tree sums.
        partials = []
        for a in range(n_hi):
            terms = []
            for b in range(n_lo):
                if full_layer_load:
                    gm = g[a * n_lo + b]               # (D1, D2), bcast over TB
                else:
                    gm = sig_ref[layer, a * n_lo + b]  # per-slice read, M large
                lp = lo_prod[b]
                terms.append(gm if lp is None else gm * lp)
            inner = _tree_sum(terms)
            hp = hi_prod[a]
            partials.append(inner if hp is None else hp * inner)
        return jnp.clip(_tree_sum(partials), 0.0, 1.0)

    if recure * layers <= 8:
        # Small trip count: full unroll (LLO scheduler visibility).
        for _ in range(recure):
            for layer in range(layers):
                state = apply_layer(state, layer)
    else:
        # Large recure: bounded code size and vreg live ranges.
        def body(_, st):
            for layer in range(layers):
                st = apply_layer(st, layer)
            return st
        state = lax.fori_loop(0, recure, body, state)

    o_ref[...] = state                                 # single store per step


def _pick_batch_block(B):
    # Largest block <= 8 that divides B while keeping >= 2 grid steps when
    # possible, so the "parallel" batch axis still shards across v7x's 2 TCs.
    best = 1
    for tb in range(2, min(B, 8) + 1):
        if B % tb == 0 and B // tb >= 2:
            best = tb
    return best


# ----------------------------------------------------------------------------
# Wrapper: raw toggle weights go straight into the kernel (sigmoid in-kernel).
# ----------------------------------------------------------------------------
def asic_forward(x, toggle_weights, *, kernel, kernel_offset="center", recure=1):
    B, D1, D2 = x.shape
    L, M, d1, d2 = toggle_weights.shape
    k1, k2 = kernel
    assert (d1, d2) == (D1, D2)
    assert M == 2 ** (k1 * k2)
    centers = _centers(kernel, kernel_offset)

    x = x.astype(jnp.float32)
    g = toggle_weights.astype(jnp.float32)

    TB = _pick_batch_block(B)
    grid = (pl.cdiv(B, TB),)

    kern = functools.partial(
        _asic_kernel, kernel=(k1, k2), centers=centers, layers=L, recure=recure)

    # Resident VMEM plan: one sigmoided gate copy (scratch; raw gates stay in
    # HBM behind pl.ANY) + double-buffered x/out blocks + compute headroom.
    gate_bytes = L * M * D1 * D2 * 4
    block_bytes = TB * D1 * D2 * 4
    vmem_need = gate_bytes + 4 * block_bytes + (4 << 20)
    # Always set the limit from the computed residency (v5e's default scoped
    # VMEM is only 16 MiB); 32 MiB floor is safe on all generations.
    # TODO(synk): configs whose resident plan exceeds ~48 MiB need an M-chunked
    # accumulator grid axis to stay inside v7x's 64 MiB VMEM.
    vmem_limit = int(max(vmem_need, 32 << 20))

    return pl.pallas_call(
        kern,
        out_shape=jax.ShapeDtypeStruct((B, D1, D2), jnp.float32),
        grid_spec=pltpu.PrefetchScalarGridSpec(
            num_scalar_prefetch=0,
            grid=grid,                                   # blocked batch axis
            in_specs=[
                pl.BlockSpec((TB, D1, D2), lambda b: (b, 0, 0)),
                pl.BlockSpec(memory_space=pl.ANY),       # gates: manual copy
            ],
            out_specs=pl.BlockSpec((TB, D1, D2), lambda b: (b, 0, 0)),
            scratch_shapes=[pltpu.VMEM((L, M, D1, D2), jnp.float32)],
        ),
        compiler_params=pltpu.CompilerParams(
            dimension_semantics=("parallel",),
            vmem_limit_bytes=vmem_limit,
        ),
    )(x, g)


# ----------------------------------------------------------------------------
# Pure-JAX reference mirroring the PyTorch forward pass (for verification).
# ----------------------------------------------------------------------------
def asic_reference(x, toggle_weights, *, kernel, kernel_offset="center", recure=1):
    k1, k2 = kernel
    nk = k1 * k2
    M = 2 ** nk
    L = toggle_weights.shape[0]
    c1, c2 = _centers(kernel, kernel_offset)
    gates = jax.nn.sigmoid(toggle_weights.astype(jnp.float32))

    bits = jnp.array(
        [[(m >> (nk - 1 - t)) & 1 for t in range(nk)] for m in range(M)],
        dtype=jnp.float32)                                       # (M, nk)

    state = x.astype(jnp.float32)
    for _ in range(recure):
        for layer in range(L):
            taps = []
            for i1 in range(k1):
                for i2 in range(k2):
                    taps.append(jnp.roll(jnp.roll(state, c1 - i1, axis=1),
                                         c2 - i2, axis=2))
            conv = jnp.stack(taps, axis=-1)                      # (B,D1,D2,nk)
            w = jnp.prod(1.0 - jnp.abs(
                bits[:, None, None, None, :] - conv[None]), axis=-1)  # (M,B,D1,D2)
            w = jnp.transpose(w, (1, 0, 2, 3))                   # (B,M,D1,D2)
            state = jnp.clip(jnp.sum(w * gates[layer][None], axis=1), 0.0, 1.0)
    return state


if __name__ == "__main__":
    # Lane-friendly ASIC grid: shape == x spatial shape -> identity embed.
    B = 8
    grid_shape = (8, 128)          # (D1, D2)
    kernel = (2, 2)                # 2x2 window -> 4 inputs -> 16 boolean combos
    num_layers = 2
    recure = 2
    M = 2 ** (kernel[0] * kernel[1])

    key = jax.random.PRNGKey(0)
    k_x, k_w = jax.random.split(key)
    x = jax.random.uniform(k_x, (B,) + grid_shape, dtype=jnp.float32)
    # torch.rand(num_layers, 2**nk, *shape) equivalent (weight_sharing=False).
    toggle_weights = jax.random.uniform(
        k_w, (num_layers, M) + grid_shape, dtype=jnp.float32)

    out = asic_forward(x, toggle_weights, kernel=kernel, recure=recure)
    out = jax.block_until_ready(out)

    ref = asic_reference(x, toggle_weights, kernel=kernel, recure=recure)
    assert out.shape == x.shape
    max_err = float(jnp.max(jnp.abs(out - ref)))
    # Remaining difference is pure f32 reassociation (factored product tree /
    # gate-sum order) plus sigmoid formulation; any algorithmic bug would show
    # up at O(0.1) error.
    assert max_err < 1e-4, f"mismatch vs reference: {max_err}"
    print("KERNEL_OK")
</pallas_src>

<mosaic_0001>
module attributes {stable_mosaic.version = 11 : i64} {
  func.func @_asic_kernel(%arg0: i32, %arg1: memref<4x8x128xf32, #tpu.memory_space<vmem>>, %arg2: memref<2x16x8x128xf32, #tpu.memory_space<any>>, %arg3: memref<4x8x128xf32, #tpu.memory_space<vmem>>, %arg4: memref<2x16x8x128xf32, #tpu.memory_space<vmem>>) attributes {dimension_semantics = [#tpu.dimension_semantics<parallel>], iteration_bounds = array<i64: 2>, scalar_prefetch = 0 : i64, scratch_operands = 1 : i64, tpu.core_type = #tpu.core_type<tc>, window_params = [{transform_indices = @transform_0, window_bounds = array<i64: 4, 8, 128>}, {}, {transform_indices = @transform_2, window_bounds = array<i64: 4, 8, 128>}]} {
    "tpu.region"() ({
      %550 = tpu.sem_alloc : memref<!tpu.dma_semaphore, #tpu.memory_space<semaphore_mem>>
      tpu.enqueue_dma source(%arg2 : memref<2x16x8x128xf32, #tpu.memory_space<any>>) target(%arg4 : memref<2x16x8x128xf32, #tpu.memory_space<vmem>>) target_semaphore(%550 : memref<!tpu.dma_semaphore, #tpu.memory_space<semaphore_mem>>)
      tpu.wait_dma2 semaphore(%550 : memref<!tpu.dma_semaphore, #tpu.memory_space<semaphore_mem>>) src(%arg2 : memref<2x16x8x128xf32, #tpu.memory_space<any>>) dst(%arg4 : memref<2x16x8x128xf32, #tpu.memory_space<vmem>>)
      tpu.yield
    }) : () -> ()
    %c0 = arith.constant 0 : index
    %c0_0 = arith.constant 0 : index
    %c0_1 = arith.constant 0 : index
    %c0_2 = arith.constant 0 : index
    %0 = vector.load %arg4[%c0, %c0_0, %c0_1, %c0_2] : memref<2x16x8x128xf32, #tpu.memory_space<vmem>>, vector<1x16x8x128xf32>
    %1 = vector.shape_cast %0 : vector<1x16x8x128xf32> to vector<16x8x128xf32>
    %cst = arith.constant 5.000000e-01 : f32
    %2 = vector.broadcast %cst : f32 to vector<16x8x128xf32>
    %3 = arith.mulf %2, %1 : vector<16x8x128xf32>
    %4 = math.tanh %3 : vector<16x8x128xf32>
    %cst_3 = arith.constant 5.000000e-01 : f32
    %5 = vector.broadcast %cst_3 : f32 to vector<16x8x128xf32>
    %6 = arith.mulf %5, %4 : vector<16x8x128xf32>
    %cst_4 = arith.constant 5.000000e-01 : f32
    %7 = vector.broadcast %cst_4 : f32 to vector<16x8x128xf32>
    %8 = arith.addf %6, %7 : vector<16x8x128xf32>
    %c0_5 = arith.constant 0 : index
    %c0_6 = arith.constant 0 : index
    %c0_7 = arith.constant 0 : index
    %c0_8 = arith.constant 0 : index
    %9 = vector.load %arg4[%c0_5, %c0_6, %c0_7, %c0_8] : memref<2x16x8x128xf32, #tpu.memory_space<vmem>>, vector<1x16x8x128xf32>
    %10 = vector.shape_cast %9 : vector<1x16x8x128xf32> to vector<16x8x128xf32>
    %11 = vector.shape_cast %8 : vector<16x8x128xf32> to vector<1x16x8x128xf32>
    tpu.vector_store %arg4[%c0_5, %c0_6, %c0_7, %c0_8], %11 {strides = array<i32>} : memref<2x16x8x128xf32, #tpu.memory_space<vmem>>, vector<1x16x8x128xf32>,
    %c1 = arith.constant 1 : index
    %c0_9 = arith.constant 0 : index
    %c0_10 = arith.constant 0 : index
    %c0_11 = arith.constant 0 : index
    %12 = vector.load %arg4[%c1, %c0_9, %c0_10, %c0_11] : memref<2x16x8x128xf32, #tpu.memory_space<vmem>>, vector<1x16x8x128xf32>
    %13 = vector.shape_cast %12 : vector<1x16x8x128xf32> to vector<16x8x128xf32>
    %cst_12 = arith.constant 5.000000e-01 : f32
    %14 = vector.broadcast %cst_12 : f32 to vector<16x8x128xf32>
    %15 = arith.mulf %14, %13 : vector<16x8x128xf32>
    %16 = math.tanh %15 : vector<16x8x128xf32>
    %cst_13 = arith.constant 5.000000e-01 : f32
    %17 = vector.broadcast %cst_13 : f32 to vector<16x8x128xf32>
    %18 = arith.mulf %17, %16 : vector<16x8x128xf32>
    %cst_14 = arith.constant 5.000000e-01 : f32
    %19 = vector.broadcast %cst_14 : f32 to vector<16x8x128xf32>
    %20 = arith.addf %18, %19 : vector<16x8x128xf32>
    %c1_15 = arith.constant 1 : index
    %c0_16 = arith.constant 0 : index
    %c0_17 = arith.constant 0 : index
    %c0_18 = arith.constant 0 : index
    %21 = vector.load %arg4[%c1_15, %c0_16, %c0_17, %c0_18] : memref<2x16x8x128xf32, #tpu.memory_space<vmem>>, vector<1x16x8x128xf32>
    %22 = vector.shape_cast %21 : vector<1x16x8x128xf32> to vector<16x8x128xf32>
    %23 = vector.shape_cast %20 : vector<16x8x128xf32> to vector<1x16x8x128xf32>
    tpu.vector_store %arg4[%c1_15, %c0_16, %c0_17, %c0_18], %23 {strides = array<i32>} : memref<2x16x8x128xf32, #tpu.memory_space<vmem>>, vector<1x16x8x128xf32>,
    %c0_19 = arith.constant 0 : index
    %c0_20 = arith.constant 0 : index
    %c0_21 = arith.constant 0 : index
    %24 = vector.load %arg1[%c0_19, %c0_20, %c0_21] : memref<4x8x128xf32, #tpu.memory_space<vmem>>, vector<4x8x128xf32>
    %cst_22 = arith.constant 0.000000e+00 : f32
    %cst_23 = arith.constant 1.000000e+00 : f32
    %25 = vector.broadcast %cst_22 : f32 to vector<4x8x128xf32>
    %26 = arith.maximumf %25, %24 : vector<4x8x128xf32>
    %27 = vector.broadcast %cst_23 : f32 to vector<4x8x128xf32>
    %28 = arith.minimumf %27, %26 : vector<4x8x128xf32>
    %29 = vector.extract_strided_slice %28 {offsets = [0, 1, 0], sizes = [4, 7, 128], strides = [1, 1, 1]} : vector<4x8x128xf32> to vector<4x7x128xf32>
    %30 = vector.extract_strided_slice %28 {offsets = [0, 0, 0], sizes = [4, 1, 128], strides = [1, 1, 1]} : vector<4x8x128xf32> to vector<4x1x128xf32>
    %31 = tpu.concatenate %29, %30 in 1 : vector<4x7x128xf32>, vector<4x1x128xf32> -> vector<4x8x128xf32>
    %32 = vector.extract_strided_slice %28 {offsets = [0, 0, 1], sizes = [4, 8, 127], strides = [1, 1, 1]} : vector<4x8x128xf32> to vector<4x8x127xf32>
    %33 = vector.extract_strided_slice %28 {offsets = [0, 0, 0], sizes = [4, 8, 1], strides = [1, 1, 1]} : vector<4x8x128xf32> to vector<4x8x1xf32>
    %34 = tpu.concatenate %32, %33 in 2 : vector<4x8x127xf32>, vector<4x8x1xf32> -> vector<4x8x128xf32>
    %35 = vector.extract_strided_slice %34 {offsets = [0, 1, 0], sizes = [4, 7, 128], strides = [1, 1, 1]} : vector<4x8x128xf32> to vector<4x7x128xf32>
    %36 = vector.extract_strided_slice %34 {offsets = [0, 0, 0], sizes = [4, 1, 128], strides = [1, 1, 1]} : vector<4x8x128xf32> to vector<4x1x128xf32>
    %37 = tpu.concatenate %35, %36 in 1 : vector<4x7x128xf32>, vector<4x1x128xf32> -> vector<4x8x128xf32>
    %cst_24 = arith.constant 1.000000e+00 : f32
    %38 = vector.broadcast %cst_24 : f32 to vector<4x8x128xf32>
    %39 = arith.subf %38, %28 : vector<4x8x128xf32>
    %cst_25 = arith.constant 1.000000e+00 : f32
    %40 = vector.broadcast %cst_25 : f32 to vector<4x8x128xf32>
    %41 = arith.subf %40, %34 : vector<4x8x128xf32>
    %42 = arith.mulf %39, %41 : vector<4x8x128xf32>
    %43 = arith.mulf %39, %34 : vector<4x8x128xf32>
    %44 = arith.mulf %28, %41 : vector<4x8x128xf32>
    %45 = arith.mulf %28, %34 : vector<4x8x128xf32>
    %cst_26 = arith.constant 1.000000e+00 : f32
    %46 = vector.broadcast %cst_26 : f32 to vector<4x8x128xf32>
    %47 = arith.subf %46, %31 : vector<4x8x128xf32>
    %cst_27 = arith.constant 1.000000e+00 : f32
    %48 = vector.broadcast %cst_27 : f32 to vector<4x8x128xf32>
    %49 = arith.subf %48, %37 : vector<4x8x128xf32>
    %50 = arith.mulf %47, %49 : vector<4x8x128xf32>
    %51 = arith.mulf %47, %37 : vector<4x8x128xf32>
    %52 = arith.mulf %31, %49 : vector<4x8x128xf32>
    %53 = arith.mulf %31, %37 : vector<4x8x128xf32>
    %c0_28 = arith.constant 0 : index
    %c0_29 = arith.constant 0 : index
    %c0_30 = arith.constant 0 : index
    %c0_31 = arith.constant 0 : index
    %54 = vector.load %arg4[%c0_28, %c0_29, %c0_30, %c0_31] : memref<2x16x8x128xf32, #tpu.memory_space<vmem>>, vector<1x16x8x128xf32>
    %55 = vector.shape_cast %54 : vector<1x16x8x128xf32> to vector<16x8x128xf32>
    %56 = vector.extract_strided_slice %55 {offsets = [0, 0, 0], sizes = [1, 8, 128], strides = [1, 1, 1]} : vector<16x8x128xf32> to vector<1x8x128xf32>
    %57 = vector.shape_cast %56 : vector<1x8x128xf32> to vector<8x128xf32>
    %58 = vector.shape_cast %57 : vector<8x128xf32> to vector<1x8x128xf32>
    %59 = vector.broadcast %58 : vector<1x8x128xf32> to vector<4x8x128xf32>
    %60 = arith.mulf %59, %50 : vector<4x8x128xf32>
    %61 = vector.extract_strided_slice %55 {offsets = [1, 0, 0], sizes = [1, 8, 128], strides = [1, 1, 1]} : vector<16x8x128xf32> to vector<1x8x128xf32>
    %62 = vector.shape_cast %61 : vector<1x8x128xf32> to vector<8x128xf32>
    %63 = vector.shape_cast %62 : vector<8x128xf32> to vector<1x8x128xf32>
    %64 = vector.broadcast %63 : vector<1x8x128xf32> to vector<4x8x128xf32>
    %65 = arith.mulf %64, %51 : vector<4x8x128xf32>
    %66 = vector.extract_strided_slice %55 {offsets = [2, 0, 0], sizes = [1, 8, 128], strides = [1, 1, 1]} : vector<16x8x128xf32> to vector<1x8x128xf32>
    %67 = vector.shape_cast %66 : vector<1x8x128xf32> to vector<8x128xf32>
    %68 = vector.shape_cast %67 : vector<8x128xf32> to vector<1x8x128xf32>
    %69 = vector.broadcast %68 : vector<1x8x128xf32> to vector<4x8x128xf32>
    %70 = arith.mulf %69, %52 : vector<4x8x128xf32>
    %71 = vector.extract_strided_slice %55 {offsets = [3, 0, 0], sizes = [1, 8, 128], strides = [1, 1, 1]} : vector<16x8x128xf32> to vector<1x8x128xf32>
    %72 = vector.shape_cast %71 : vector<1x8x128xf32> to vector<8x128xf32>
    %73 = vector.shape_cast %72 : vector<8x128xf32> to vector<1x8x128xf32>
    %74 = vector.broadcast %73 : vector<1x8x128xf32> to vector<4x8x128xf32>
    %75 = arith.mulf %74, %53 : vector<4x8x128xf32>
    %76 = arith.addf %60, %65 : vector<4x8x128xf32>
    %77 = arith.addf %70, %75 : vector<4x8x128xf32>
    %78 = arith.addf %76, %77 : vector<4x8x128xf32>
    %79 = arith.mulf %42, %78 : vector<4x8x128xf32>
    %80 = vector.extract_strided_slice %55 {offsets = [4, 0, 0], sizes = [1, 8, 128], strides = [1, 1, 1]} : vector<16x8x128xf32> to vector<1x8x128xf32>
    %81 = vector.shape_cast %80 : vector<1x8x128xf32> to vector<8x128xf32>
    %82 = vector.shape_cast %81 : vector<8x128xf32> to vector<1x8x128xf32>
    %83 = vector.broadcast %82 : vector<1x8x128xf32> to vector<4x8x128xf32>
    %84 = arith.mulf %83, %50 : vector<4x8x128xf32>
    %85 = vector.extract_strided_slice %55 {offsets = [5, 0, 0], sizes = [1, 8, 128], strides = [1, 1, 1]} : vector<16x8x128xf32> to vector<1x8x128xf32>
    %86 = vector.shape_cast %85 : vector<1x8x128xf32> to vector<8x128xf32>
    %87 = vector.shape_cast %86 : vector<8x128xf32> to vector<1x8x128xf32>
    %88 = vector.broadcast %87 : vector<1x8x128xf32> to vector<4x8x128xf32>
    %89 = arith.mulf %88, %51 : vector<4x8x128xf32>
    %90 = vector.extract_strided_slice %55 {offsets = [6, 0, 0], sizes = [1, 8, 128], strides = [1, 1, 1]} : vector<16x8x128xf32> to vector<1x8x128xf32>
    %91 = vector.shape_cast %90 : vector<1x8x128xf32> to vector<8x128xf32>
    %92 = vector.shape_cast %91 : vector<8x128xf32> to vector<1x8x128xf32>
    %93 = vector.broadcast %92 : vector<1x8x128xf32> to vector<4x8x128xf32>
    %94 = arith.mulf %93, %52 : vector<4x8x128xf32>
    %95 = vector.extract_strided_slice %55 {offsets = [7, 0, 0], sizes = [1, 8, 128], strides = [1, 1, 1]} : vector<16x8x128xf32> to vector<1x8x128xf32>
    %96 = vector.shape_cast %95 : vector<1x8x128xf32> to vector<8x128xf32>
    %97 = vector.shape_cast %96 : vector<8x128xf32> to vector<1x8x128xf32>
    %98 = vector.broadcast %97 : vector<1x8x128xf32> to vector<4x8x128xf32>
    %99 = arith.mulf %98, %53 : vector<4x8x128xf32>
    %100 = arith.addf %84, %89 : vector<4x8x128xf32>
    %101 = arith.addf %94, %99 : vector<4x8x128xf32>
    %102 = arith.addf %100, %101 : vector<4x8x128xf32>
    %103 = arith.mulf %43, %102 : vector<4x8x128xf32>
    %104 = vector.extract_strided_slice %55 {offsets = [8, 0, 0], sizes = [1, 8, 128], strides = [1, 1, 1]} : vector<16x8x128xf32> to vector<1x8x128xf32>
    %105 = vector.shape_cast %104 : vector<1x8x128xf32> to vector<8x128xf32>
    %106 = vector.shape_cast %105 : vector<8x128xf32> to vector<1x8x128xf32>
    %107 = vector.broadcast %106 : vector<1x8x128xf32> to vector<4x8x128xf32>
    %108 = arith.mulf %107, %50 : vector<4x8x128xf32>
    %109 = vector.extract_strided_slice %55 {offsets = [9, 0, 0], sizes = [1, 8, 128], strides = [1, 1, 1]} : vector<16x8x128xf32> to vector<1x8x128xf32>
    %110 = vector.shape_cast %109 : vector<1x8x128xf32> to vector<8x128xf32>
    %111 = vector.shape_cast %110 : vector<8x128xf32> to vector<1x8x128xf32>
    %112 = vector.broadcast %111 : vector<1x8x128xf32> to vector<4x8x128xf32>
    %113 = arith.mulf %112, %51 : vector<4x8x128xf32>
    %114 = vector.extract_strided_slice %55 {offsets = [10, 0, 0], sizes = [1, 8, 128], strides = [1, 1, 1]} : vector<16x8x128xf32> to vector<1x8x128xf32>
    %115 = vector.shape_cast %114 : vector<1x8x128xf32> to vector<8x128xf32>
    %116 = vector.shape_cast %115 : vector<8x128xf32> to vector<1x8x128xf32>
    %117 = vector.broadcast %116 : vector<1x8x128xf32> to vector<4x8x128xf32>
    %118 = arith.mulf %117, %52 : vector<4x8x128xf32>
    %119 = vector.extract_strided_slice %55 {offsets = [11, 0, 0], sizes = [1, 8, 128], strides = [1, 1, 1]} : vector<16x8x128xf32> to vector<1x8x128xf32>
    %120 = vector.shape_cast %119 : vector<1x8x128xf32> to vector<8x128xf32>
    %121 = vector.shape_cast %120 : vector<8x128xf32> to vector<1x8x128xf32>
    %122 = vector.broadcast %121 : vector<1x8x128xf32> to vector<4x8x128xf32>
    %123 = arith.mulf %122, %53 : vector<4x8x128xf32>
    %124 = arith.addf %108, %113 : vector<4x8x128xf32>
    %125 = arith.addf %118, %123 : vector<4x8x128xf32>
    %126 = arith.addf %124, %125 : vector<4x8x128xf32>
    %127 = arith.mulf %44, %126 : vector<4x8x128xf32>
    %128 = vector.extract_strided_slice %55 {offsets = [12, 0, 0], sizes = [1, 8, 128], strides = [1, 1, 1]} : vector<16x8x128xf32> to vector<1x8x128xf32>
    %129 = vector.shape_cast %128 : vector<1x8x128xf32> to vector<8x128xf32>
    %130 = vector.shape_cast %129 : vector<8x128xf32> to vector<1x8x128xf32>
    %131 = vector.broadcast %130 : vector<1x8x128xf32> to vector<4x8x128xf32>
    %132 = arith.mulf %131, %50 : vector<4x8x128xf32>
    %133 = vector.extract_strided_slice %55 {offsets = [13, 0, 0], sizes = [1, 8, 128], strides = [1, 1, 1]} : vector<16x8x128xf32> to vector<1x8x128xf32>
    %134 = vector.shape_cast %133 : vector<1x8x128xf32> to vector<8x128xf32>
    %135 = vector.shape_cast %134 : vector<8x128xf32> to vector<1x8x128xf32>
    %136 = vector.broadcast %135 : vector<1x8x128xf32> to vector<4x8x128xf32>
    %137 = arith.mulf %136, %51 : vector<4x8x128xf32>
    %138 = vector.extract_strided_slice %55 {offsets = [14, 0, 0], sizes = [1, 8, 128], strides = [1, 1, 1]} : vector<16x8x128xf32> to vector<1x8x128xf32>
    %139 = vector.shape_cast %138 : vector<1x8x128xf32> to vector<8x128xf32>
    %140 = vector.shape_cast %139 : vector<8x128xf32> to vector<1x8x128xf32>
    %141 = vector.broadcast %140 : vector<1x8x128xf32> to vector<4x8x128xf32>
    %142 = arith.mulf %141, %52 : vector<4x8x128xf32>
    %143 = vector.extract_strided_slice %55 {offsets = [15, 0, 0], sizes = [1, 8, 128], strides = [1, 1, 1]} : vector<16x8x128xf32> to vector<1x8x128xf32>
    %144 = vector.shape_cast %143 : vector<1x8x128xf32> to vector<8x128xf32>
    %145 = vector.shape_cast %144 : vector<8x128xf32> to vector<1x8x128xf32>
    %146 = vector.broadcast %145 : vector<1x8x128xf32> to vector<4x8x128xf32>
    %147 = arith.mulf %146, %53 : vector<4x8x128xf32>
    %148 = arith.addf %132, %137 : vector<4x8x128xf32>
    %149 = arith.addf %142, %147 : vector<4x8x128xf32>
    %150 = arith.addf %148, %149 : vector<4x8x128xf32>
    %151 = arith.mulf %45, %150 : vector<4x8x128xf32>
    %152 = arith.addf %79, %103 : vector<4x8x128xf32>
    %153 = arith.addf %127, %151 : vector<4x8x128xf32>
    %154 = arith.addf %152, %153 : vector<4x8x128xf32>
    %cst_32 = arith.constant 0.000000e+00 : f32
    %cst_33 = arith.constant 1.000000e+00 : f32
    %155 = vector.broadcast %cst_32 : f32 to vector<4x8x128xf32>
    %156 = arith.maximumf %155, %154 : vector<4x8x128xf32>
    %157 = vector.broadcast %cst_33 : f32 to vector<4x8x128xf32>
    %158 = arith.minimumf %157, %156 : vector<4x8x128xf32>
    %159 = vector.extract_strided_slice %158 {offsets = [0, 1, 0], sizes = [4, 7, 128], strides = [1, 1, 1]} : vector<4x8x128xf32> to vector<4x7x128xf32>
    %160 = vector.extract_strided_slice %158 {offsets = [0, 0, 0], sizes = [4, 1, 128], strides = [1, 1, 1]} : vector<4x8x128xf32> to vector<4x1x128xf32>
    %161 = tpu.concatenate %159, %160 in 1 : vector<4x7x128xf32>, vector<4x1x128xf32> -> vector<4x8x128xf32>
    %162 = vector.extract_strided_slice %158 {offsets = [0, 0, 1], sizes = [4, 8, 127], strides = [1, 1, 1]} : vector<4x8x128xf32> to vector<4x8x127xf32>
    %163 = vector.extract_strided_slice %158 {offsets = [0, 0, 0], sizes = [4, 8, 1], strides = [1, 1, 1]} : vector<4x8x128xf32> to vector<4x8x1xf32>
    %164 = tpu.concatenate %162, %163 in 2 : vector<4x8x127xf32>, vector<4x8x1xf32> -> vector<4x8x128xf32>
    %165 = vector.extract_strided_slice %164 {offsets = [0, 1, 0], sizes = [4, 7, 128], strides = [1, 1, 1]} : vector<4x8x128xf32> to vector<4x7x128xf32>
    %166 = vector.extract_strided_slice %164 {offsets = [0, 0, 0], sizes = [4, 1, 128], strides = [1, 1, 1]} : vector<4x8x128xf32> to vector<4x1x128xf32>
    %167 = tpu.concatenate %165, %166 in 1 : vector<4x7x128xf32>, vector<4x1x128xf32> -> vector<4x8x128xf32>
    %cst_34 = arith.constant 1.000000e+00 : f32
    %168 = vector.broadcast %cst_34 : f32 to vector<4x8x128xf32>
    %169 = arith.subf %168, %158 : vector<4x8x128xf32>
    %cst_35 = arith.constant 1.000000e+00 : f32
    %170 = vector.broadcast %cst_35 : f32 to vector<4x8x128xf32>
    %171 = arith.subf %170, %164 : vector<4x8x128xf32>
    %172 = arith.mulf %169, %171 : vector<4x8x128xf32>
    %173 = arith.mulf %169, %164 : vector<4x8x128xf32>
    %174 = arith.mulf %158, %171 : vector<4x8x128xf32>
    %175 = arith.mulf %158, %164 : vector<4x8x128xf32>
    %cst_36 = arith.constant 1.000000e+00 : f32
    %176 = vector.broadcast %cst_36 : f32 to vector<4x8x128xf32>
    %177 = arith.subf %176, %161 : vector<4x8x128xf32>
    %cst_37 = arith.constant 1.000000e+00 : f32
    %178 = vector.broadcast %cst_37 : f32 to vector<4x8x128xf32>
    %179 = arith.subf %178, %167 : vector<4x8x128xf32>
    %180 = arith.mulf %177, %179 : vector<4x8x128xf32>
    %181 = arith.mulf %177, %167 : vector<4x8x128xf32>
    %182 = arith.mulf %161, %179 : vector<4x8x128xf32>
    %183 = arith.mulf %161, %167 : vector<4x8x128xf32>
    %c1_38 = arith.constant 1 : index
    %c0_39 = arith.constant 0 : index
    %c0_40 = arith.constant 0 : index
    %c0_41 = arith.constant 0 : index
    %184 = vector.load %arg4[%c1_38, %c0_39, %c0_40, %c0_41] : memref<2x16x8x128xf32, #tpu.memory_space<vmem>>, vector<1x16x8x128xf32>
    %185 = vector.shape_cast %184 : vector<1x16x8x128xf32> to vector<16x8x128xf32>
    %186 = vector.extract_strided_slice %185 {offsets = [0, 0, 0], sizes = [1, 8, 128], strides = [1, 1, 1]} : vector<16x8x128xf32> to vector<1x8x128xf32>
    %187 = vector.shape_cast %186 : vector<1x8x128xf32> to vector<8x128xf32>
    %188 = vector.shape_cast %187 : vector<8x128xf32> to vector<1x8x128xf32>
    %189 = vector.broadcast %188 : vector<1x8x128xf32> to vector<4x8x128xf32>
    %190 = arith.mulf %189, %180 : vector<4x8x128xf32>
    %191 = vector.extract_strided_slice %185 {offsets = [1, 0, 0], sizes = [1, 8, 128], strides = [1, 1, 1]} : vector<16x8x128xf32> to vector<1x8x128xf32>
    %192 = vector.shape_cast %191 : vector<1x8x128xf32> to vector<8x128xf32>
    %193 = vector.shape_cast %192 : vector<8x128xf32> to vector<1x8x128xf32>
    %194 = vector.broadcast %193 : vector<1x8x128xf32> to vector<4x8x128xf32>
    %195 = arith.mulf %194, %181 : vector<4x8x128xf32>
    %196 = vector.extract_strided_slice %185 {offsets = [2, 0, 0], sizes = [1, 8, 128], strides = [1, 1, 1]} : vector<16x8x128xf32> to vector<1x8x128xf32>
    %197 = vector.shape_cast %196 : vector<1x8x128xf32> to vector<8x128xf32>
    %198 = vector.shape_cast %197 : vector<8x128xf32> to vector<1x8x128xf32>
    %199 = vector.broadcast %198 : vector<1x8x128xf32> to vector<4x8x128xf32>
    %200 = arith.mulf %199, %182 : vector<4x8x128xf32>
    %201 = vector.extract_strided_slice %185 {offsets = [3, 0, 0], sizes = [1, 8, 128], strides = [1, 1, 1]} : vector<16x8x128xf32> to vector<1x8x128xf32>
    %202 = vector.shape_cast %201 : vector<1x8x128xf32> to vector<8x128xf32>
    %203 = vector.shape_cast %202 : vector<8x128xf32> to vector<1x8x128xf32>
    %204 = vector.broadcast %203 : vector<1x8x128xf32> to vector<4x8x128xf32>
    %205 = arith.mulf %204, %183 : vector<4x8x128xf32>
    %206 = arith.addf %190, %195 : vector<4x8x128xf32>
    %207 = arith.addf %200, %205 : vector<4x8x128xf32>
    %208 = arith.addf %206, %207 : vector<4x8x128xf32>
    %209 = arith.mulf %172, %208 : vector<4x8x128xf32>
    %210 = vector.extract_strided_slice %185 {offsets = [4, 0, 0], sizes = [1, 8, 128], strides = [1, 1, 1]} : vector<16x8x128xf32> to vector<1x8x128xf32>
    %211 = vector.shape_cast %210 : vector<1x8x128xf32> to vector<8x128xf32>
    %212 = vector.shape_cast %211 : vector<8x128xf32> to vector<1x8x128xf32>
    %213 = vector.broadcast %212 : vector<1x8x128xf32> to vector<4x8x128xf32>
    %214 = arith.mulf %213, %180 : vector<4x8x128xf32>
    %215 = vector.extract_strided_slice %185 {offsets = [5, 0, 0], sizes = [1, 8, 128], strides = [1, 1, 1]} : vector<16x8x128xf32> to vector<1x8x128xf32>
    %216 = vector.shape_cast %215 : vector<1x8x128xf32> to vector<8x128xf32>
    %217 = vector.shape_cast %216 : vector<8x128xf32> to vector<1x8x128xf32>
    %218 = vector.broadcast %217 : vector<1x8x128xf32> to vector<4x8x128xf32>
    %219 = arith.mulf %218, %181 : vector<4x8x128xf32>
    %220 = vector.extract_strided_slice %185 {offsets = [6, 0, 0], sizes = [1, 8, 128], strides = [1, 1, 1]} : vector<16x8x128xf32> to vector<1x8x128xf32>
    %221 = vector.shape_cast %220 : vector<1x8x128xf32> to vector<8x128xf32>
    %222 = vector.shape_cast %221 : vector<8x128xf32> to vector<1x8x128xf32>
    %223 = vector.broadcast %222 : vector<1x8x128xf32> to vector<4x8x128xf32>
    %224 = arith.mulf %223, %182 : vector<4x8x128xf32>
    %225 = vector.extract_strided_slice %185 {offsets = [7, 0, 0], sizes = [1, 8, 128], strides = [1, 1, 1]} : vector<16x8x128xf32> to vector<1x8x128xf32>
    %226 = vector.shape_cast %225 : vector<1x8x128xf32> to vector<8x128xf32>
    %227 = vector.shape_cast %226 : vector<8x128xf32> to vector<1x8x128xf32>
    %228 = vector.broadcast %227 : vector<1x8x128xf32> to vector<4x8x128xf32>
    %229 = arith.mulf %228, %183 : vector<4x8x128xf32>
    %230 = arith.addf %214, %219 : vector<4x8x128xf32>
    %231 = arith.addf %224, %229 : vector<4x8x128xf32>
    %232 = arith.addf %230, %231 : vector<4x8x128xf32>
    %233 = arith.mulf %173, %232 : vector<4x8x128xf32>
    %234 = vector.extract_strided_slice %185 {offsets = [8, 0, 0], sizes = [1, 8, 128], strides = [1, 1, 1]} : vector<16x8x128xf32> to vector<1x8x128xf32>
    %235 = vector.shape_cast %234 : vector<1x8x128xf32> to vector<8x128xf32>
    %236 = vector.shape_cast %235 : vector<8x128xf32> to vector<1x8x128xf32>
    %237 = vector.broadcast %236 : vector<1x8x128xf32> to vector<4x8x128xf32>
    %238 = arith.mulf %237, %180 : vector<4x8x128xf32>
    %239 = vector.extract_strided_slice %185 {offsets = [9, 0, 0], sizes = [1, 8, 128], strides = [1, 1, 1]} : vector<16x8x128xf32> to vector<1x8x128xf32>
    %240 = vector.shape_cast %239 : vector<1x8x128xf32> to vector<8x128xf32>
    %241 = vector.shape_cast %240 : vector<8x128xf32> to vector<1x8x128xf32>
    %242 = vector.broadcast %241 : vector<1x8x128xf32> to vector<4x8x128xf32>
    %243 = arith.mulf %242, %181 : vector<4x8x128xf32>
    %244 = vector.extract_strided_slice %185 {offsets = [10, 0, 0], sizes = [1, 8, 128], strides = [1, 1, 1]} : vector<16x8x128xf32> to vector<1x8x128xf32>
    %245 = vector.shape_cast %244 : vector<1x8x128xf32> to vector<8x128xf32>
    %246 = vector.shape_cast %245 : vector<8x128xf32> to vector<1x8x128xf32>
    %247 = vector.broadcast %246 : vector<1x8x128xf32> to vector<4x8x128xf32>
    %248 = arith.mulf %247, %182 : vector<4x8x128xf32>
    %249 = vector.extract_strided_slice %185 {offsets = [11, 0, 0], sizes = [1, 8, 128], strides = [1, 1, 1]} : vector<16x8x128xf32> to vector<1x8x128xf32>
    %250 = vector.shape_cast %249 : vector<1x8x128xf32> to vector<8x128xf32>
    %251 = vector.shape_cast %250 : vector<8x128xf32> to vector<1x8x128xf32>
    %252 = vector.broadcast %251 : vector<1x8x128xf32> to vector<4x8x128xf32>
    %253 = arith.mulf %252, %183 : vector<4x8x128xf32>
    %254 = arith.addf %238, %243 : vector<4x8x128xf32>
    %255 = arith.addf %248, %253 : vector<4x8x128xf32>
    %256 = arith.addf %254, %255 : vector<4x8x128xf32>
    %257 = arith.mulf %174, %256 : vector<4x8x128xf32>
    %258 = vector.extract_strided_slice %185 {offsets = [12, 0, 0], sizes = [1, 8, 128], strides = [1, 1, 1]} : vector<16x8x128xf32> to vector<1x8x128xf32>
    %259 = vector.shape_cast %258 : vector<1x8x128xf32> to vector<8x128xf32>
    %260 = vector.shape_cast %259 : vector<8x128xf32> to vector<1x8x128xf32>
    %261 = vector.broadcast %260 : vector<1x8x128xf32> to vector<4x8x128xf32>
    %262 = arith.mulf %261, %180 : vector<4x8x128xf32>
    %263 = vector.extract_strided_slice %185 {offsets = [13, 0, 0], sizes = [1, 8, 128], strides = [1, 1, 1]} : vector<16x8x128xf32> to vector<1x8x128xf32>
    %264 = vector.shape_cast %263 : vector<1x8x128xf32> to vector<8x128xf32>
    %265 = vector.shape_cast %264 : vector<8x128xf32> to vector<1x8x128xf32>
    %266 = vector.broadcast %265 : vector<1x8x128xf32> to vector<4x8x128xf32>
    %267 = arith.mulf %266, %181 : vector<4x8x128xf32>
    %268 = vector.extract_strided_slice %185 {offsets = [14, 0, 0], sizes = [1, 8, 128], strides = [1, 1, 1]} : vector<16x8x128xf32> to vector<1x8x128xf32>
    %269 = vector.shape_cast %268 : vector<1x8x128xf32> to vector<8x128xf32>
    %270 = vector.shape_cast %269 : vector<8x128xf32> to vector<1x8x128xf32>
    %271 = vector.broadcast %270 : vector<1x8x128xf32> to vector<4x8x128xf32>
    %272 = arith.mulf %271, %182 : vector<4x8x128xf32>
    %273 = vector.extract_strided_slice %185 {offsets = [15, 0, 0], sizes = [1, 8, 128], strides = [1, 1, 1]} : vector<16x8x128xf32> to vector<1x8x128xf32>
    %274 = vector.shape_cast %273 : vector<1x8x128xf32> to vector<8x128xf32>
    %275 = vector.shape_cast %274 : vector<8x128xf32> to vector<1x8x128xf32>
    %276 = vector.broadcast %275 : vector<1x8x128xf32> to vector<4x8x128xf32>
    %277 = arith.mulf %276, %183 : vector<4x8x128xf32>
    %278 = arith.addf %262, %267 : vector<4x8x128xf32>
    %279 = arith.addf %272, %277 : vector<4x8x128xf32>
    %280 = arith.addf %278, %279 : vector<4x8x128xf32>
    %281 = arith.mulf %175, %280 : vector<4x8x128xf32>
    %282 = arith.addf %209, %233 : vector<4x8x128xf32>
    %283 = arith.addf %257, %281 : vector<4x8x128xf32>
    %284 = arith.addf %282, %283 : vector<4x8x128xf32>
    %cst_42 = arith.constant 0.000000e+00 : f32
    %cst_43 = arith.constant 1.000000e+00 : f32
    %285 = vector.broadcast %cst_42 : f32 to vector<4x8x128xf32>
    %286 = arith.maximumf %285, %284 : vector<4x8x128xf32>
    %287 = vector.broadcast %cst_43 : f32 to vector<4x8x128xf32>
    %288 = arith.minimumf %287, %286 : vector<4x8x128xf32>
    %289 = vector.extract_strided_slice %288 {offsets = [0, 1, 0], sizes = [4, 7, 128], strides = [1, 1, 1]} : vector<4x8x128xf32> to vector<4x7x128xf32>
    %290 = vector.extract_strided_slice %288 {offsets = [0, 0, 0], sizes = [4, 1, 128], strides = [1, 1, 1]} : vector<4x8x128xf32> to vector<4x1x128xf32>
    %291 = tpu.concatenate %289, %290 in 1 : vector<4x7x128xf32>, vector<4x1x128xf32> -> vector<4x8x128xf32>
    %292 = vector.extract_strided_slice %288 {offsets = [0, 0, 1], sizes = [4, 8, 127], strides = [1, 1, 1]} : vector<4x8x128xf32> to vector<4x8x127xf32>
    %293 = vector.extract_strided_slice %288 {offsets = [0, 0, 0], sizes = [4, 8, 1], strides = [1, 1, 1]} : vector<4x8x128xf32> to vector<4x8x1xf32>
    %294 = tpu.concatenate %292, %293 in 2 : vector<4x8x127xf32>, vector<4x8x1xf32> -> vector<4x8x128xf32>
    %295 = vector.extract_strided_slice %294 {offsets = [0, 1, 0], sizes = [4, 7, 128], strides = [1, 1, 1]} : vector<4x8x128xf32> to vector<4x7x128xf32>
    %296 = vector.extract_strided_slice %294 {offsets = [0, 0, 0], sizes = [4, 1, 128], strides = [1, 1, 1]} : vector<4x8x128xf32> to vector<4x1x128xf32>
    %297 = tpu.concatenate %295, %296 in 1 : vector<4x7x128xf32>, vector<4x1x128xf32> -> vector<4x8x128xf32>
    %cst_44 = arith.constant 1.000000e+00 : f32
    %298 = vector.broadcast %cst_44 : f32 to vector<4x8x128xf32>
    %299 = arith.subf %298, %288 : vector<4x8x128xf32>
    %cst_45 = arith.constant 1.000000e+00 : f32
    %300 = vector.broadcast %cst_45 : f32 to vector<4x8x128xf32>
    %301 = arith.subf %300, %294 : vector<4x8x128xf32>
    %302 = arith.mulf %299, %301 : vector<4x8x128xf32>
    %303 = arith.mulf %299, %294 : vector<4x8x128xf32>
    %304 = arith.mulf %288, %301 : vector<4x8x128xf32>
    %305 = arith.mulf %288, %294 : vector<4x8x128xf32>
    %cst_46 = arith.constant 1.000000e+00 : f32
    %306 = vector.broadcast %cst_46 : f32 to vector<4x8x128xf32>
    %307 = arith.subf %306, %291 : vector<4x8x128xf32>
    %cst_47 = arith.constant 1.000000e+00 : f32
    %308 = vector.broadcast %cst_47 : f32 to vector<4x8x128xf32>
    %309 = arith.subf %308, %297 : vector<4x8x128xf32>
    %310 = arith.mulf %307, %309 : vector<4x8x128xf32>
    %311 = arith.mulf %307, %297 : vector<4x8x128xf32>
    %312 = arith.mulf %291, %309 : vector<4x8x128xf32>
    %313 = arith.mulf %291, %297 : vector<4x8x128xf32>
    %c0_48 = arith.constant 0 : index
    %c0_49 = arith.constant 0 : index
    %c0_50 = arith.constant 0 : index
    %c0_51 = arith.constant 0 : index
    %314 = vector.load %arg4[%c0_48, %c0_49, %c0_50, %c0_51] : memref<2x16x8x128xf32, #tpu.memory_space<vmem>>, vector<1x16x8x128xf32>
    %315 = vector.shape_cast %314 : vector<1x16x8x128xf32> to vector<16x8x128xf32>
    %316 = vector.extract_strided_slice %315 {offsets = [0, 0, 0], sizes = [1, 8, 128], strides = [1, 1, 1]} : vector<16x8x128xf32> to vector<1x8x128xf32>
    %317 = vector.shape_cast %316 : vector<1x8x128xf32> to vector<8x128xf32>
    %318 = vector.shape_cast %317 : vector<8x128xf32> to vector<1x8x128xf32>
    %319 = vector.broadcast %318 : vector<1x8x128xf32> to vector<4x8x128xf32>
    %320 = arith.mulf %319, %310 : vector<4x8x128xf32>
    %321 = vector.extract_strided_slice %315 {offsets = [1, 0, 0], sizes = [1, 8, 128], strides = [1, 1, 1]} : vector<16x8x128xf32> to vector<1x8x128xf32>
    %322 = vector.shape_cast %321 : vector<1x8x128xf32> to vector<8x128xf32>
    %323 = vector.shape_cast %322 : vector<8x128xf32> to vector<1x8x128xf32>
    %324 = vector.broadcast %323 : vector<1x8x128xf32> to vector<4x8x128xf32>
    %325 = arith.mulf %324, %311 : vector<4x8x128xf32>
    %326 = vector.extract_strided_slice %315 {offsets = [2, 0, 0], sizes = [1, 8, 128], strides = [1, 1, 1]} : vector<16x8x128xf32> to vector<1x8x128xf32>
    %327 = vector.shape_cast %326 : vector<1x8x128xf32> to vector<8x128xf32>
    %328 = vector.shape_cast %327 : vector<8x128xf32> to vector<1x8x128xf32>
    %329 = vector.broadcast %328 : vector<1x8x128xf32> to vector<4x8x128xf32>
    %330 = arith.mulf %329, %312 : vector<4x8x128xf32>
    %331 = vector.extract_strided_slice %315 {offsets = [3, 0, 0], sizes = [1, 8, 128], strides = [1, 1, 1]} : vector<16x8x128xf32> to vector<1x8x128xf32>
    %332 = vector.shape_cast %331 : vector<1x8x128xf32> to vector<8x128xf32>
    %333 = vector.shape_cast %332 : vector<8x128xf32> to vector<1x8x128xf32>
    %334 = vector.broadcast %333 : vector<1x8x128xf32> to vector<4x8x128xf32>
    %335 = arith.mulf %334, %313 : vector<4x8x128xf32>
    %336 = arith.addf %320, %325 : vector<4x8x128xf32>
    %337 = arith.addf %330, %335 : vector<4x8x128xf32>
    %338 = arith.addf %336, %337 : vector<4x8x128xf32>
    %339 = arith.mulf %302, %338 : vector<4x8x128xf32>
    %340 = vector.extract_strided_slice %315 {offsets = [4, 0, 0], sizes = [1, 8, 128], strides = [1, 1, 1]} : vector<16x8x128xf32> to vector<1x8x128xf32>
    %341 = vector.shape_cast %340 : vector<1x8x128xf32> to vector<8x128xf32>
    %342 = vector.shape_cast %341 : vector<8x128xf32> to vector<1x8x128xf32>
    %343 = vector.broadcast %342 : vector<1x8x128xf32> to vector<4x8x128xf32>
    %344 = arith.mulf %343, %310 : vector<4x8x128xf32>
    %345 = vector.extract_strided_slice %315 {offsets = [5, 0, 0], sizes = [1, 8, 128], strides = [1, 1, 1]} : vector<16x8x128xf32> to vector<1x8x128xf32>
    %346 = vector.shape_cast %345 : vector<1x8x128xf32> to vector<8x128xf32>
    %347 = vector.shape_cast %346 : vector<8x128xf32> to vector<1x8x128xf32>
    %348 = vector.broadcast %347 : vector<1x8x128xf32> to vector<4x8x128xf32>
    %349 = arith.mulf %348, %311 : vector<4x8x128xf32>
    %350 = vector.extract_strided_slice %315 {offsets = [6, 0, 0], sizes = [1, 8, 128], strides = [1, 1, 1]} : vector<16x8x128xf32> to vector<1x8x128xf32>
    %351 = vector.shape_cast %350 : vector<1x8x128xf32> to vector<8x128xf32>
    %352 = vector.shape_cast %351 : vector<8x128xf32> to vector<1x8x128xf32>
    %353 = vector.broadcast %352 : vector<1x8x128xf32> to vector<4x8x128xf32>
    %354 = arith.mulf %353, %312 : vector<4x8x128xf32>
    %355 = vector.extract_strided_slice %315 {offsets = [7, 0, 0], sizes = [1, 8, 128], strides = [1, 1, 1]} : vector<16x8x128xf32> to vector<1x8x128xf32>
    %356 = vector.shape_cast %355 : vector<1x8x128xf32> to vector<8x128xf32>
    %357 = vector.shape_cast %356 : vector<8x128xf32> to vector<1x8x128xf32>
    %358 = vector.broadcast %357 : vector<1x8x128xf32> to vector<4x8x128xf32>
    %359 = arith.mulf %358, %313 : vector<4x8x128xf32>
    %360 = arith.addf %344, %349 : vector<4x8x128xf32>
    %361 = arith.addf %354, %359 : vector<4x8x128xf32>
    %362 = arith.addf %360, %361 : vector<4x8x128xf32>
    %363 = arith.mulf %303, %362 : vector<4x8x128xf32>
    %364 = vector.extract_strided_slice %315 {offsets = [8, 0, 0], sizes = [1, 8, 128], strides = [1, 1, 1]} : vector<16x8x128xf32> to vector<1x8x128xf32>
    %365 = vector.shape_cast %364 : vector<1x8x128xf32> to vector<8x128xf32>
    %366 = vector.shape_cast %365 : vector<8x128xf32> to vector<1x8x128xf32>
    %367 = vector.broadcast %366 : vector<1x8x128xf32> to vector<4x8x128xf32>
    %368 = arith.mulf %367, %310 : vector<4x8x128xf32>
    %369 = vector.extract_strided_slice %315 {offsets = [9, 0, 0], sizes = [1, 8, 128], strides = [1, 1, 1]} : vector<16x8x128xf32> to vector<1x8x128xf32>
    %370 = vector.shape_cast %369 : vector<1x8x128xf32> to vector<8x128xf32>
    %371 = vector.shape_cast %370 : vector<8x128xf32> to vector<1x8x128xf32>
    %372 = vector.broadcast %371 : vector<1x8x128xf32> to vector<4x8x128xf32>
    %373 = arith.mulf %372, %311 : vector<4x8x128xf32>
    %374 = vector.extract_strided_slice %315 {offsets = [10, 0, 0], sizes = [1, 8, 128], strides = [1, 1, 1]} : vector<16x8x128xf32> to vector<1x8x128xf32>
    %375 = vector.shape_cast %374 : vector<1x8x128xf32> to vector<8x128xf32>
    %376 = vector.shape_cast %375 : vector<8x128xf32> to vector<1x8x128xf32>
    %377 = vector.broadcast %376 : vector<1x8x128xf32> to vector<4x8x128xf32>
    %378 = arith.mulf %377, %312 : vector<4x8x128xf32>
    %379 = vector.extract_strided_slice %315 {offsets = [11, 0, 0], sizes = [1, 8, 128], strides = [1, 1, 1]} : vector<16x8x128xf32> to vector<1x8x128xf32>
    %380 = vector.shape_cast %379 : vector<1x8x128xf32> to vector<8x128xf32>
    %381 = vector.shape_cast %380 : vector<8x128xf32> to vector<1x8x128xf32>
    %382 = vector.broadcast %381 : vector<1x8x128xf32> to vector<4x8x128xf32>
    %383 = arith.mulf %382, %313 : vector<4x8x128xf32>
    %384 = arith.addf %368, %373 : vector<4x8x128xf32>
    %385 = arith.addf %378, %383 : vector<4x8x128xf32>
    %386 = arith.addf %384, %385 : vector<4x8x128xf32>
    %387 = arith.mulf %304, %386 : vector<4x8x128xf32>
    %388 = vector.extract_strided_slice %315 {offsets = [12, 0, 0], sizes = [1, 8, 128], strides = [1, 1, 1]} : vector<16x8x128xf32> to vector<1x8x128xf32>
    %389 = vector.shape_cast %388 : vector<1x8x128xf32> to vector<8x128xf32>
    %390 = vector.shape_cast %389 : vector<8x128xf32> to vector<1x8x128xf32>
    %391 = vector.broadcast %390 : vector<1x8x128xf32> to vector<4x8x128xf32>
    %392 = arith.mulf %391, %310 : vector<4x8x128xf32>
    %393 = vector.extract_strided_slice %315 {offsets = [13, 0, 0], sizes = [1, 8, 128], strides = [1, 1, 1]} : vector<16x8x128xf32> to vector<1x8x128xf32>
    %394 = vector.shape_cast %393 : vector<1x8x128xf32> to vector<8x128xf32>
    %395 = vector.shape_cast %394 : vector<8x128xf32> to vector<1x8x128xf32>
    %396 = vector.broadcast %395 : vector<1x8x128xf32> to vector<4x8x128xf32>
    %397 = arith.mulf %396, %311 : vector<4x8x128xf32>
    %398 = vector.extract_strided_slice %315 {offsets = [14, 0, 0], sizes = [1, 8, 128], strides = [1, 1, 1]} : vector<16x8x128xf32> to vector<1x8x128xf32>
    %399 = vector.shape_cast %398 : vector<1x8x128xf32> to vector<8x128xf32>
    %400 = vector.shape_cast %399 : vector<8x128xf32> to vector<1x8x128xf32>
    %401 = vector.broadcast %400 : vector<1x8x128xf32> to vector<4x8x128xf32>
    %402 = arith.mulf %401, %312 : vector<4x8x128xf32>
    %403 = vector.extract_strided_slice %315 {offsets = [15, 0, 0], sizes = [1, 8, 128], strides = [1, 1, 1]} : vector<16x8x128xf32> to vector<1x8x128xf32>
    %404 = vector.shape_cast %403 : vector<1x8x128xf32> to vector<8x128xf32>
    %405 = vector.shape_cast %404 : vector<8x128xf32> to vector<1x8x128xf32>
    %406 = vector.broadcast %405 : vector<1x8x128xf32> to vector<4x8x128xf32>
    %407 = arith.mulf %406, %313 : vector<4x8x128xf32>
    %408 = arith.addf %392, %397 : vector<4x8x128xf32>
    %409 = arith.addf %402, %407 : vector<4x8x128xf32>
    %410 = arith.addf %408, %409 : vector<4x8x128xf32>
    %411 = arith.mulf %305, %410 : vector<4x8x128xf32>
    %412 = arith.addf %339, %363 : vector<4x8x128xf32>
    %413 = arith.addf %387, %411 : vector<4x8x128xf32>
    %414 = arith.addf %412, %413 : vector<4x8x128xf32>
    %cst_52 = arith.constant 0.000000e+00 : f32
    %cst_53 = arith.constant 1.000000e+00 : f32
    %415 = vector.broadcast %cst_52 : f32 to vector<4x8x128xf32>
    %416 = arith.maximumf %415, %414 : vector<4x8x128xf32>
    %417 = vector.broadcast %cst_53 : f32 to vector<4x8x128xf32>
    %418 = arith.minimumf %417, %416 : vector<4x8x128xf32>
    %419 = vector.extract_strided_slice %418 {offsets = [0, 1, 0], sizes = [4, 7, 128], strides = [1, 1, 1]} : vector<4x8x128xf32> to vector<4x7x128xf32>
    %420 = vector.extract_strided_slice %418 {offsets = [0, 0, 0], sizes = [4, 1, 128], strides = [1, 1, 1]} : vector<4x8x128xf32> to vector<4x1x128xf32>
    %421 = tpu.concatenate %419, %420 in 1 : vector<4x7x128xf32>, vector<4x1x128xf32> -> vector<4x8x128xf32>
    %422 = vector.extract_strided_slice %418 {offsets = [0, 0, 1], sizes = [4, 8, 127], strides = [1, 1, 1]} : vector<4x8x128xf32> to vector<4x8x127xf32>
    %423 = vector.extract_strided_slice %418 {offsets = [0, 0, 0], sizes = [4, 8, 1], strides = [1, 1, 1]} : vector<4x8x128xf32> to vector<4x8x1xf32>
    %424 = tpu.concatenate %422, %423 in 2 : vector<4x8x127xf32>, vector<4x8x1xf32> -> vector<4x8x128xf32>
    %425 = vector.extract_strided_slice %424 {offsets = [0, 1, 0], sizes = [4, 7, 128], strides = [1, 1, 1]} : vector<4x8x128xf32> to vector<4x7x128xf32>
    %426 = vector.extract_strided_slice %424 {offsets = [0, 0, 0], sizes = [4, 1, 128], strides = [1, 1, 1]} : vector<4x8x128xf32> to vector<4x1x128xf32>
    %427 = tpu.concatenate %425, %426 in 1 : vector<4x7x128xf32>, vector<4x1x128xf32> -> vector<4x8x128xf32>
    %cst_54 = arith.constant 1.000000e+00 : f32
    %428 = vector.broadcast %cst_54 : f32 to vector<4x8x128xf32>
    %429 = arith.subf %428, %418 : vector<4x8x128xf32>
    %cst_55 = arith.constant 1.000000e+00 : f32
    %430 = vector.broadcast %cst_55 : f32 to vector<4x8x128xf32>
    %431 = arith.subf %430, %424 : vector<4x8x128xf32>
    %432 = arith.mulf %429, %431 : vector<4x8x128xf32>
    %433 = arith.mulf %429, %424 : vector<4x8x128xf32>
    %434 = arith.mulf %418, %431 : vector<4x8x128xf32>
    %435 = arith.mulf %418, %424 : vector<4x8x128xf32>
    %cst_56 = arith.constant 1.000000e+00 : f32
    %436 = vector.broadcast %cst_56 : f32 to vector<4x8x128xf32>
    %437 = arith.subf %436, %421 : vector<4x8x128xf32>
    %cst_57 = arith.constant 1.000000e+00 : f32
    %438 = vector.broadcast %cst_57 : f32 to vector<4x8x128xf32>
    %439 = arith.subf %438, %427 : vector<4x8x128xf32>
    %440 = arith.mulf %437, %439 : vector<4x8x128xf32>
    %441 = arith.mulf %437, %427 : vector<4x8x128xf32>
    %442 = arith.mulf %421, %439 : vector<4x8x128xf32>
    %443 = arith.mulf %421, %427 : vector<4x8x128xf32>
    %c1_58 = arith.constant 1 : index
    %c0_59 = arith.constant 0 : index
    %c0_60 = arith.constant 0 : index
    %c0_61 = arith.constant 0 : index
    %444 = vector.load %arg4[%c1_58, %c0_59, %c0_60, %c0_61] : memref<2x16x8x128xf32, #tpu.memory_space<vmem>>, vector<1x16x8x128xf32>
    %445 = vector.shape_cast %444 : vector<1x16x8x128xf32> to vector<16x8x128xf32>
    %446 = vector.extract_strided_slice %445 {offsets = [0, 0, 0], sizes = [1, 8, 128], strides = [1, 1, 1]} : vector<16x8x128xf32> to vector<1x8x128xf32>
    %447 = vector.shape_cast %446 : vector<1x8x128xf32> to vector<8x128xf32>
    %448 = vector.shape_cast %447 : vector<8x128xf32> to vector<1x8x128xf32>
    %449 = vector.broadcast %448 : vector<1x8x128xf32> to vector<4x8x128xf32>
    %450 = arith.mulf %449, %440 : vector<4x8x128xf32>
    %451 = vector.extract_strided_slice %445 {offsets = [1, 0, 0], sizes = [1, 8, 128], strides = [1, 1, 1]} : vector<16x8x128xf32> to vector<1x8x128xf32>
    %452 = vector.shape_cast %451 : vector<1x8x128xf32> to vector<8x128xf32>
    %453 = vector.shape_cast %452 : vector<8x128xf32> to vector<1x8x128xf32>
    %454 = vector.broadcast %453 : vector<1x8x128xf32> to vector<4x8x128xf32>
    %455 = arith.mulf %454, %441 : vector<4x8x128xf32>
    %456 = vector.extract_strided_slice %445 {offsets = [2, 0, 0], sizes = [1, 8, 128], strides = [1, 1, 1]} : vector<16x8x128xf32> to vector<1x8x128xf32>
    %457 = vector.shape_cast %456 : vector<1x8x128xf32> to vector<8x128xf32>
    %458 = vector.shape_cast %457 : vector<8x128xf32> to vector<1x8x128xf32>
    %459 = vector.broadcast %458 : vector<1x8x128xf32> to vector<4x8x128xf32>
    %460 = arith.mulf %459, %442 : vector<4x8x128xf32>
    %461 = vector.extract_strided_slice %445 {offsets = [3, 0, 0], sizes = [1, 8, 128], strides = [1, 1, 1]} : vector<16x8x128xf32> to vector<1x8x128xf32>
    %462 = vector.shape_cast %461 : vector<1x8x128xf32> to vector<8x128xf32>
    %463 = vector.shape_cast %462 : vector<8x128xf32> to vector<1x8x128xf32>
    %464 = vector.broadcast %463 : vector<1x8x128xf32> to vector<4x8x128xf32>
    %465 = arith.mulf %464, %443 : vector<4x8x128xf32>
    %466 = arith.addf %450, %455 : vector<4x8x128xf32>
    %467 = arith.addf %460, %465 : vector<4x8x128xf32>
    %468 = arith.addf %466, %467 : vector<4x8x128xf32>
    %469 = arith.mulf %432, %468 : vector<4x8x128xf32>
    %470 = vector.extract_strided_slice %445 {offsets = [4, 0, 0], sizes = [1, 8, 128], strides = [1, 1, 1]} : vector<16x8x128xf32> to vector<1x8x128xf32>
    %471 = vector.shape_cast %470 : vector<1x8x128xf32> to vector<8x128xf32>
    %472 = vector.shape_cast %471 : vector<8x128xf32> to vector<1x8x128xf32>
    %473 = vector.broadcast %472 : vector<1x8x128xf32> to vector<4x8x128xf32>
    %474 = arith.mulf %473, %440 : vector<4x8x128xf32>
    %475 = vector.extract_strided_slice %445 {offsets = [5, 0, 0], sizes = [1, 8, 128], strides = [1, 1, 1]} : vector<16x8x128xf32> to vector<1x8x128xf32>
    %476 = vector.shape_cast %475 : vector<1x8x128xf32> to vector<8x128xf32>
    %477 = vector.shape_cast %476 : vector<8x128xf32> to vector<1x8x128xf32>
    %478 = vector.broadcast %477 : vector<1x8x128xf32> to vector<4x8x128xf32>
    %479 = arith.mulf %478, %441 : vector<4x8x128xf32>
    %480 = vector.extract_strided_slice %445 {offsets = [6, 0, 0], sizes = [1, 8, 128], strides = [1, 1, 1]} : vector<16x8x128xf32> to vector<1x8x128xf32>
    %481 = vector.shape_cast %480 : vector<1x8x128xf32> to vector<8x128xf32>
    %482 = vector.shape_cast %481 : vector<8x128xf32> to vector<1x8x128xf32>
    %483 = vector.broadcast %482 : vector<1x8x128xf32> to vector<4x8x128xf32>
    %484 = arith.mulf %483, %442 : vector<4x8x128xf32>
    %485 = vector.extract_strided_slice %445 {offsets = [7, 0, 0], sizes = [1, 8, 128], strides = [1, 1, 1]} : vector<16x8x128xf32> to vector<1x8x128xf32>
    %486 = vector.shape_cast %485 : vector<1x8x128xf32> to vector<8x128xf32>
    %487 = vector.shape_cast %486 : vector<8x128xf32> to vector<1x8x128xf32>
    %488 = vector.broadcast %487 : vector<1x8x128xf32> to vector<4x8x128xf32>
    %489 = arith.mulf %488, %443 : vector<4x8x128xf32>
    %490 = arith.addf %474, %479 : vector<4x8x128xf32>
    %491 = arith.addf %484, %489 : vector<4x8x128xf32>
    %492 = arith.addf %490, %491 : vector<4x8x128xf32>
    %493 = arith.mulf %433, %492 : vector<4x8x128xf32>
    %494 = vector.extract_strided_slice %445 {offsets = [8, 0, 0], sizes = [1, 8, 128], strides = [1, 1, 1]} : vector<16x8x128xf32> to vector<1x8x128xf32>
    %495 = vector.shape_cast %494 : vector<1x8x128xf32> to vector<8x128xf32>
    %496 = vector.shape_cast %495 : vector<8x128xf32> to vector<1x8x128xf32>
    %497 = vector.broadcast %496 : vector<1x8x128xf32> to vector<4x8x128xf32>
    %498 = arith.mulf %497, %440 : vector<4x8x128xf32>
    %499 = vector.extract_strided_slice %445 {offsets = [9, 0, 0], sizes = [1, 8, 128], strides = [1, 1, 1]} : vector<16x8x128xf32> to vector<1x8x128xf32>
    %500 = vector.shape_cast %499 : vector<1x8x128xf32> to vector<8x128xf32>
    %501 = vector.shape_cast %500 : vector<8x128xf32> to vector<1x8x128xf32>
    %502 = vector.broadcast %501 : vector<1x8x128xf32> to vector<4x8x128xf32>
    %503 = arith.mulf %502, %441 : vector<4x8x128xf32>
    %504 = vector.extract_strided_slice %445 {offsets = [10, 0, 0], sizes = [1, 8, 128], strides = [1, 1, 1]} : vector<16x8x128xf32> to vector<1x8x128xf32>
    %505 = vector.shape_cast %504 : vector<1x8x128xf32> to vector<8x128xf32>
    %506 = vector.shape_cast %505 : vector<8x128xf32> to vector<1x8x128xf32>
    %507 = vector.broadcast %506 : vector<1x8x128xf32> to vector<4x8x128xf32>
    %508 = arith.mulf %507, %442 : vector<4x8x128xf32>
    %509 = vector.extract_strided_slice %445 {offsets = [11, 0, 0], sizes = [1, 8, 128], strides = [1, 1, 1]} : vector<16x8x128xf32> to vector<1x8x128xf32>
    %510 = vector.shape_cast %509 : vector<1x8x128xf32> to vector<8x128xf32>
    %511 = vector.shape_cast %510 : vector<8x128xf32> to vector<1x8x128xf32>
    %512 = vector.broadcast %511 : vector<1x8x128xf32> to vector<4x8x128xf32>
    %513 = arith.mulf %512, %443 : vector<4x8x128xf32>
    %514 = arith.addf %498, %503 : vector<4x8x128xf32>
    %515 = arith.addf %508, %513 : vector<4x8x128xf32>
    %516 = arith.addf %514, %515 : vector<4x8x128xf32>
    %517 = arith.mulf %434, %516 : vector<4x8x128xf32>
    %518 = vector.extract_strided_slice %445 {offsets = [12, 0, 0], sizes = [1, 8, 128], strides = [1, 1, 1]} : vector<16x8x128xf32> to vector<1x8x128xf32>
    %519 = vector.shape_cast %518 : vector<1x8x128xf32> to vector<8x128xf32>
    %520 = vector.shape_cast %519 : vector<8x128xf32> to vector<1x8x128xf32>
    %521 = vector.broadcast %520 : vector<1x8x128xf32> to vector<4x8x128xf32>
    %522 = arith.mulf %521, %440 : vector<4x8x128xf32>
    %523 = vector.extract_strided_slice %445 {offsets = [13, 0, 0], sizes = [1, 8, 128], strides = [1, 1, 1]} : vector<16x8x128xf32> to vector<1x8x128xf32>
    %524 = vector.shape_cast %523 : vector<1x8x128xf32> to vector<8x128xf32>
    %525 = vector.shape_cast %524 : vector<8x128xf32> to vector<1x8x128xf32>
    %526 = vector.broadcast %525 : vector<1x8x128xf32> to vector<4x8x128xf32>
    %527 = arith.mulf %526, %441 : vector<4x8x128xf32>
    %528 = vector.extract_strided_slice %445 {offsets = [14, 0, 0], sizes = [1, 8, 128], strides = [1, 1, 1]} : vector<16x8x128xf32> to vector<1x8x128xf32>
    %529 = vector.shape_cast %528 : vector<1x8x128xf32> to vector<8x128xf32>
    %530 = vector.shape_cast %529 : vector<8x128xf32> to vector<1x8x128xf32>
    %531 = vector.broadcast %530 : vector<1x8x128xf32> to vector<4x8x128xf32>
    %532 = arith.mulf %531, %442 : vector<4x8x128xf32>
    %533 = vector.extract_strided_slice %445 {offsets = [15, 0, 0], sizes = [1, 8, 128], strides = [1, 1, 1]} : vector<16x8x128xf32> to vector<1x8x128xf32>
    %534 = vector.shape_cast %533 : vector<1x8x128xf32> to vector<8x128xf32>
    %535 = vector.shape_cast %534 : vector<8x128xf32> to vector<1x8x128xf32>
    %536 = vector.broadcast %535 : vector<1x8x128xf32> to vector<4x8x128xf32>
    %537 = arith.mulf %536, %443 : vector<4x8x128xf32>
    %538 = arith.addf %522, %527 : vector<4x8x128xf32>
    %539 = arith.addf %532, %537 : vector<4x8x128xf32>
    %540 = arith.addf %538, %539 : vector<4x8x128xf32>
    %541 = arith.mulf %435, %540 : vector<4x8x128xf32>
    %542 = arith.addf %469, %493 : vector<4x8x128xf32>
    %543 = arith.addf %517, %541 : vector<4x8x128xf32>
    %544 = arith.addf %542, %543 : vector<4x8x128xf32>
    %cst_62 = arith.constant 0.000000e+00 : f32
    %cst_63 = arith.constant 1.000000e+00 : f32
    %545 = vector.broadcast %cst_62 : f32 to vector<4x8x128xf32>
    %546 = arith.maximumf %545, %544 : vector<4x8x128xf32>
    %547 = vector.broadcast %cst_63 : f32 to vector<4x8x128xf32>
    %548 = arith.minimumf %547, %546 : vector<4x8x128xf32>
    %c0_64 = arith.constant 0 : index
    %c0_65 = arith.constant 0 : index
    %c0_66 = arith.constant 0 : index
    %549 = vector.load %arg3[%c0_64, %c0_65, %c0_66] : memref<4x8x128xf32, #tpu.memory_space<vmem>>, vector<4x8x128xf32>
    tpu.vector_store %arg3[%c0_64, %c0_65, %c0_66], %548 {strides = array<i32>} : memref<4x8x128xf32, #tpu.memory_space<vmem>>, vector<4x8x128xf32>,
    return
  }
  func.func @transform_0(%arg0: i32) -> (i32, i32, i32) {
    %c0_i32 = arith.constant 0 : i32
    %c0_i32_0 = arith.constant 0 : i32
    %c0_i32_1 = arith.constant 0 : i32
    return %arg0, %c0_i32, %c0_i32_0 : i32, i32, i32
  }
  func.func @transform_2(%arg0: i32) -> (i32, i32, i32) {
    %c0_i32 = arith.constant 0 : i32
    %c0_i32_0 = arith.constant 0 : i32
    %c0_i32_1 = arith.constant 0 : i32
    return %arg0, %c0_i32, %c0_i32_0 : i32, i32, i32
  }
}

</mosaic_0001>

<bundles_post_ra>
// kernel: tpu_custom_call.1
= control target key start
LH: loop header
LB: loop body
LE: loop exit
PB: predicated region body
PF: predicated region fallthrough
CT: control target
= control target key end

     0   :  { %7 = vsyncpa [#allocation4], 0  ;;  %s2661_s0 = inlined_call_operand.hbm [shape: f32[8,8,128], index: 0, kind: input, shape index: {}]   ;;  %s2662_s1 = inlined_call_operand.hbm [shape: f32[2,16,8,128], index: 1, kind: input, shape index: {}]   ;;  %s2663_s2 = inlined_call_operand.hbm [shape: f32[8,8,128], index: 2, kind: output, shape index: {}]  }
   0x1   :  { %9 = vsyncpa [#allocation4 + $0x1], 0 }
   0x2   :  { %10 = vsyncpa [#allocation5], 0 }
   0x3   :  { %12 = vsyncpa [#allocation5 + $0x1], 0  ;;  %s1746_s9 = smov 0   ;;  %s1748_s10 = smov 0  }
   0x4   :  { %s1750_s11 = smov 0   ;;  %s1752_s12 = smov 0  }
   0x5 LB: > { %s1767_s13 = sadd.s32 4294967295, %s1721_s12   ;;  %s1443_s14 = sadd.s32 4294967294, %s1721_s12   ;;  %s1721_s12 = sphi %s1752_s12, %s2751_s12   ;;  %s1717_s11 = sphi %s1750_s11, %s2750_s11   ;;  %s1713_s10 = sphi %s1748_s10, %s2749_s10   ;;  %s1709_s9 = sphi %s1746_s9, %s2748_s9  }
   0x6   : > { %s1771_s15 = sadd.s32 1, %s1721_s12   ;;  %s25_s16 = sadd.s32 1, %s1717_s11 }
   0x7   : > { %s22_s17 = ssub.s32 %s1721_s12, %s1771_s15  ;;  %p32_p0 = scmp.ne.s32.totalorder %s1717_s11, %s1713_s10 }
   0x8   : > { %p23_p1 = scmp.eq.s32.totalorder %s22_s17, 0  ;;  %p33_p2 = scmp.eq.s32.totalorder %s1721_s12, 0 }
   0x9   : > { %p38_p3 = scmp.ne.s32.totalorder %s1713_s10, %s1709_s9  ;;  %p39_p4 = scmp.eq.s32.totalorder %s1767_s13, 0 }
   0xa   : > { %s1783_s18 = scalar_select %p23_p1, %s1717_s11, %s25_s16  }
   0xb   : > { %p1785_p5 = por %p33_p2, %p32_p0  ;;  %p1789_p6 = por %p39_p4, %p38_p3 }
   0xc   : > { %p62_p7 = scmp.eq.s32.totalorder %s1767_s13, 1  ;;  %p68_p8 = scmp.eq.s32.totalorder %s1443_s14, 1 }
   0xd   : > { %s2701_s20 = scalar_select %p1789_p6, 1, 0 }
   0xe   : > { %p1471_p10 = scmp.lt.s32.totalorder %s1721_s12, 2  ;;  %p1796_p11 = por %p62_p7, %p32_p0 }
   0xf   : > { %p1800_p12 = por %p68_p8, %p38_p3  ;;  %s88_s23 = sand.u32 1, %s1717_s11  }
  0x10   : > { %s2702_s21 = scalar_select %p1796_p11, 1, 0 }
  0x11   : > { %s2703_s22 = scalar_select %p1800_p12, 1, 0 }
  0x12   : > { %s1457_s24 = sshll.u32 %s1721_s12, 9  ;;  %s1446_s25 = sshll.u32 %s88_s23, 5 }
  0x13   : > { %s1809_s28 = scalar_lea.hbm %s2661_s0, %s1457_s24  ;;  %s92_s29 = scalar_lea.vmem [#allocation3], %s1446_s25 }
  0x14   : > { %s99_s30 = sshll.u32 %s92_s29, 4  ;;  %p1813_p13 = pnand %p1471_p10, %p1785_p5  ;;  %s1817_s30 = int_to_ptr.vmem [resolvable:$true] %s99_s30 }
  0x15   : > { %s1819_s4 = scalar_lea.sflag [#allocation4], %s88_s23  ;;  %s1607_s5 = scalar_lea.hbm %s1809_s28, 512 }
  0x16   : > { %p1608_p0 = scmp.ne.s32.totalorder %s1809_s28, %s1607_s5  ;;  %p1609_p1 = pneg %p1813_p13 }
  0x17   : > { %s1612_s8 = scalar_lea.hbm %s2661_s0, 1024  ;;  %p1613_p4 = scmp.lt.s32.totalorder %s1809_s28, %s2661_s0 }
  0x18   : > { %p1610_p2 = pnand %p1609_p1, %p1608_p0  ;;  %p1614_p5 = scmp.lt.s32.totalorder %s1612_s8, %s1607_s5 }
  0x1a   : > { %p1611_p3 = pneg %p1610_p2  ;;  %p1615_p7 = por %p1614_p5, %p1613_p4 }
  0x1c   : > { %p1616_p8 = pnand %p1615_p7, %p1611_p3 }
  0x1e   : > { %1619 = shalt.err (!%p1616_p8)
}
  0x1f   : > { %s1620_s17 = scalar_lea.vmem %s1817_s30, 512  ;;  %s1723_s19 = smov [#allocation3]  }
  0x20   : > { %p1621_p10 = scmp.ne.s32.totalorder %s1817_s30, %s1620_s17  ;;  %s1625_s23 = sshll.u32 %s1723_s19, 4  ;;  %s1626_s23 = int_to_ptr.vmem [resolvable:$false] %s1625_s23 }
  0x21   : > { %s1627_s24 = scalar_lea.vmem %s1626_s23, 1024  ;;  %p1628_p2 = scmp.lt.s32.totalorder %s1817_s30, %s1626_s23 }
  0x22   : > { %p1623_p9 = pnand %p1621_p10, %p1609_p1  ;;  %p1629_p12 = scmp.lt.s32.totalorder %s1627_s24, %s1620_s17 }
  0x24   : > { %p1624_p0 = pneg %p1623_p9  ;;  %p1630_p11 = por %p1629_p12, %p1628_p2 }
  0x26   : > { %p1631_p6 = pnand %p1630_p11, %p1624_p0 }
  0x28   : > { %1634 = shalt.err (!%p1631_p6)
}
  0x29   : > { %s1724_s25 = smov 128   ;;  %s1725_s26 = smov 8  }
  0x2a   : > { %1466 = dma.hbm_to_vmem [thread:$0]  (!%p1813_p13), %s1809_s28, 512, %s1817_s30, %s1819_s4, %s1724_s25, %s1724_s25, %s1725_s26  }
  0x2b   : > { %p1449_p9 = scmp.ge.s32.totalorder %s1721_s12, 1  ;;  %p107_p1 = scmp.lt.s32.totalorder %s1721_s12, 3 }
  0x2d   : > { %p108_p3 = pnand %p1449_p9, %p107_p1 }
  0x2f   : > { %111 = sbr.rel (%p108_p3) target bundleno = 728 (0x2d8), region = 24 }
  0x34   : > { %s1843_s27 = sand.u32 1, %s1713_s10   ;;  %p2705_p6 = scmp.ne.s32.totalorder %s2701_s20, 0 }
  0x35   : > { %s1450_s29 = sshll.u32 %s1843_s27, 5  ;;  %s114_s5 = scalar_lea.sflag [#allocation4], %s1843_s27 }
  0x36   : > { %s117_s6 = scalar_lea.vmem [#allocation3], %s1450_s29 }
  0x37   : > { %1698 = dma.done.wait (%p2705_p6), %s114_s5, 512  }
  0x38   : > { %1700 = vsyncadd (%p2705_p6), %s114_s5, 4294966784  ;;  %s1851_s3 = scalar_lea.vmem [#allocation6], %s1450_s29 }
  0x39   : > { %s1726_s28 = smov [#allocation2]  }
  0x3a   : > { %s145_s30 = sshll.u32 %s1726_s28, 4  ;;  %s146_s30 = int_to_ptr.vmem [resolvable:$true] %s145_s30 }
  0x3b   : > { %s1643_s4 = scalar_lea.vmem %s146_s30, 4096  ;;  %p1648_p12 = scmp.lt.s32.totalorder %s146_s30, %s146_s30 }
  0x3c   : > { %p1644_p11 = scmp.ne.s32.totalorder %s146_s30, %s1643_s4  ;;  %p1649_p13 = scmp.lt.s32.totalorder %s1643_s4, %s1643_s4 }
  0x3e   : > { %p1650_p4 = por %p1649_p13, %p1648_p12 }
  0x40   : > { %p1651_p5 = pnand %p1650_p4, %p1644_p11 }
  0x42   : > { %1654 = shalt.err (!%p1651_p5)  }
  0x43   : > { %148 = dma.hbm_to_vmem [thread:$0]  %s2662_s1, 4096, %s146_s30, [#allocation7] }
  0x44   : > { %1701 = dma.done.wait [#allocation7], 4096 }
  0x45   : > { %1702 = vsyncadd [#allocation7], 4294963200  ;;  %v349_v0 = vld [vmem:[%s117_s6 + $0x10] sm:$0xff]  ;;  %v347_v1 = vld [vmem:[%s117_s6] sm:$0xff]  ;;  %s1727_s20 = smov 127   ;;  %s1458_s14 = sshll.u32 %s1767_s13, 9 }
  0x46   : > { %v350_v2 = vld [vmem:[%s117_s6 + $0x18] sm:$0xff]  ;;  %v353_v3 = vmax.f32 %v349_v0, 0.0  ;;  %v351_v4 = vmax.f32 %v347_v1, 0.0  ;;  %v348_v6 = vld [vmem:[%s117_s6 + $0x8] sm:$0xff]  ;;  %v154_v7 = vld [vmem:[#allocation2] sm:$0xff]  ;;  %s1370_s16 = sshll.u32 %s1851_s3, 4  ;;  %s2615_s23 = scalar_lea.hbm %s2663_s2, %s1458_s14  ;;  %s2617_s16 = int_to_ptr.vmem [resolvable:$true] %s1370_s16 }
  0x47   : > { %v354_v5 = vmax.f32 %v350_v2, 0.0  ;;  %v155_v8 = vld [vmem:[#allocation2 + $0x8] sm:$0xff]  ;;  %v352_v9 = vmax.f32 %v348_v6, 0.0  ;;  %v156_v10 = vld [vmem:[#allocation2 + $0x10] sm:$0xff]  ;;  %v157_v11 = vld [vmem:[#allocation2 + $0x18] sm:$0xff]  ;;  %v170_v12 = vmul.f32 0.5, %v154_v7 }
  0x48   : > { %v171_v13 = vmul.f32 0.5, %v155_v8  ;;  %v1856_v14 = vmin.f32 %v353_v3, 1.0  ;;  %v1858_v15 = vmin.f32 %v351_v4, 1.0  ;;  %v158_v16 = vld [vmem:[#allocation2 + $0x20] sm:$0xff]  ;;  %v159_v17 = vld [vmem:[#allocation2 + $0x28] sm:$0xff]  ;;  %v172_v18 = vmul.f32 0.5, %v156_v10 }
  0x49   : > { %1511 = vtanh.f32 %v170_v12  ;;  %v1864_v19 = vmin.f32 %v354_v5, 1.0  ;;  %v1866_v20 = vmin.f32 %v352_v9, 1.0  ;;  %v160_v21 = vld [vmem:[#allocation2 + $0x30] sm:$0xff]  ;;  %v173_v22 = vmul.f32 0.5, %v157_v11  ;;  %v161_v23 = vld [vmem:[#allocation2 + $0x38] sm:$0xff]  ;;  %v162_v25 = vld [vmem:[#allocation2 + $0x40] sm:$0xff] }
  0x4a   : > { %380 = vrot.lane.b32.xlu1 %v1856_v14, %s1727_s20  ;;  %376 = vrot.lane.b32.xlu0 %v1858_v15, %s1727_s20  ;;  %1513 = vtanh.f32 %v171_v13  ;;  %v174_v24 = vmul.f32 0.5, %v158_v16  ;;  %v175_v26 = vmul.f32 0.5, %v159_v17  ;;  %v163_v27 = vld [vmem:[#allocation2 + $0x48] sm:$0xff]  ;;  %v176_v28 = vmul.f32 0.5, %v160_v21  ;;  %v164_v29 = vld [vmem:[#allocation2 + $0x50] sm:$0xff]  ;;  %v165_v31 = vld [vmem:[#allocation2 + $0x58] sm:$0xff] }
  0x4b   : > { %1515 = vtanh.f32 %v172_v18  ;;  %v177_v30 = vmul.f32 0.5, %v161_v23  ;;  %v178_v32 = vmul.f32 0.5, %v162_v25  ;;  %v166_v33 = vld [vmem:[#allocation2 + $0x60] sm:$0xff]  ;;  %v179_v34 = vmul.f32 0.5, %v163_v27  ;;  %v167_v35 = vld [vmem:[#allocation2 + $0x68] sm:$0xff]  ;;  %v168_v37 = vld [vmem:[#allocation2 + $0x70] sm:$0xff] }
  0x4c   : > { %1517 = vtanh.f32 %v173_v22  ;;  %v180_v36 = vmul.f32 0.5, %v164_v29  ;;  %v181_v38 = vmul.f32 0.5, %v165_v31  ;;  %v169_v39 = vld [vmem:[#allocation2 + $0x78] sm:$0xff]  ;;  %v182_v40 = vmul.f32 0.5, %v166_v33  ;;  %v252_v33 = vld [vmem:[#allocation2 + $0x88] sm:$0xff]  ;;  %s1357_s24 = scalar_lea.sflag [#allocation5], %s1843_s27 }
  0x4d   : > { %1519 = vtanh.f32 %v174_v24  ;;  %v183_v41 = vmul.f32 0.5, %v167_v35  ;;  %v184_v42 = vmul.f32 0.5, %v168_v37  ;;  %v185_v44 = vmul.f32 0.5, %v169_v39  ;;  %v254_v35 = vld [vmem:[#allocation2 + $0x98] sm:$0xff]  ;;  %v256_v37 = vld [vmem:[#allocation2 + $0xa8] sm:$0xff]  ;;  %s1655_s25 = scalar_lea.vmem %s2617_s16, 512 }
  0x4e   : > { %382 = vrot.lane.b32.xlu1 %v1864_v19, %s1727_s20  ;;  %378 = vrot.lane.b32.xlu0 %v1866_v20, %s1727_s20  ;;  %1521 = vtanh.f32 %v175_v26  ;;  %v268_v39 = vmul.f32 0.5, %v252_v33  ;;  %p1656_p7 = scmp.ne.s32.totalorder %s2617_s16, %s1655_s25  ;;  %p2745_p8 = scmp.ne.s32.totalorder %s2702_s21, 0 }
  0x4f   : > { %1523 = vtanh.f32 %v176_v28  ;;  %s1728_s13 = smov [#allocation6]  }
  0x50   : > { %1525 = vtanh.f32 %v177_v30  ;;  %p1657_p10 = pnand %p1656_p7, %p2745_p8  ;;  %s1659_s26 = sshll.u32 %s1728_s13, 4  ;;  %s1660_s26 = int_to_ptr.vmem [resolvable:$false] %s1659_s26 }
  0x51   : > { %1527 = vtanh.f32 %v178_v32  ;;  %v251_v32 = vld [vmem:[#allocation2 + $0x80] sm:$0xff]  ;;  %s1661_s29 = scalar_lea.vmem %s1660_s26, 1024  ;;  %p1662_p2 = scmp.lt.s32.totalorder %s2617_s16, %s1660_s26 }
  0x52   : > { %1529 = vtanh.f32 %v179_v34  ;;  %v253_v34 = vld [vmem:[#allocation2 + $0x90] sm:$0xff]  ;;  %p1658_p0 = pneg %p1657_p10  ;;  %p1663_p9 = scmp.lt.s32.totalorder %s1661_s29, %s1655_s25 }
  0x53   : > { %1531 = vtanh.f32 %v180_v36  ;;  %v255_v36 = vld [vmem:[#allocation2 + $0xa0] sm:$0xff] }
  0x54   : > { %1533 = vtanh.f32 %v181_v38  ;;  %v267_v38 = vmul.f32 0.5, %v251_v32  ;;  %p1664_p1 = por %p1663_p9, %p1662_p2 }
  0x55   : > { %1535 = vtanh.f32 %v182_v40  ;;  %v269_v40 = vmul.f32 0.5, %v253_v34 }
  0x56   : > { %v1512_v43 = vpop.eup %1511  ;;  %1537 = vtanh.f32 %v183_v41  ;;  %v257_v41 = vld [vmem:[#allocation2 + $0xb0] sm:$0xff]  ;;  %p1665_p3 = pnand %p1664_p1, %p1658_p0 }
  0x57   : > { %v1514_v45 = vpop.eup %1513  ;;  %v202_v46 = vmul.f32 0.5, %v1512_v43  ;;  %1539 = vtanh.f32 %v184_v42  ;;  %v270_v42 = vmul.f32 0.5, %v254_v35  ;;  %v258_v43 = vld [vmem:[#allocation2 + $0xb8] sm:$0xff] }
  0x58   : > { %v203_v47 = vmul.f32 0.5, %v1514_v45  ;;  %v1516_v49 = vpop.eup %1515  ;;  %1541 = vtanh.f32 %v185_v44  ;;  %v271_v44 = vmul.f32 0.5, %v255_v36  ;;  %v259_v45 = vld [vmem:[#allocation2 + $0xc0] sm:$0xff] }
  0x59   : > { %v1872_v48 = vadd.f32 0.5, %v202_v46  ;;  %v1518_v51 = vpop.eup %1517  ;;  %v204_v52 = vmul.f32 0.5, %v1516_v49  ;;  %1543 = vtanh.f32 %v267_v38  ;;  %v272_v46 = vmul.f32 0.5, %v256_v37 }
  0x5a   : > { %v1874_v50 = vadd.f32 0.5, %v203_v47  ;;  %v1520_v53 = vpop.eup %1519  ;;  %v205_v54 = vmul.f32 0.5, %v1518_v51  ;;  %1545 = vtanh.f32 %v268_v39  ;;  %v260_v47 = vld [vmem:[#allocation2 + $0xc8] sm:$0xff]  ;;  %v273_v49 = vmul.f32 0.5, %v257_v41  ;;  %v261_v51 = vld [vmem:[#allocation2 + $0xd0] sm:$0xff] }
  0x5b   : > { %234 = vst [vmem:[#allocation2] sm:$0xff] %v1872_v48  ;;  %v1522_v55 = vpop.eup %1521  ;;  %v206_v56 = vmul.f32 0.5, %v1520_v53  ;;  %v1878_v57 = vadd.f32 0.5, %v204_v52  ;;  %1547 = vtanh.f32 %v269_v40  ;;  %v274_v52 = vmul.f32 0.5, %v258_v43  ;;  %v262_v53 = vld [vmem:[#allocation2 + $0xd8] sm:$0xff] }
  0x5c   : > { %235 = vst [vmem:[#allocation2 + $0x8] sm:$0xff] %v1874_v50  ;;  %v1524_v58 = vpop.eup %1523  ;;  %v207_v59 = vmul.f32 0.5, %v1522_v55  ;;  %v1880_v60 = vadd.f32 0.5, %v205_v54  ;;  %1549 = vtanh.f32 %v270_v42  ;;  %v275_v54 = vmul.f32 0.5, %v259_v45  ;;  %v263_v55 = vld [vmem:[#allocation2 + $0xe0] sm:$0xff] }
  0x5d   : > { %v1526_v61 = vpop.eup %1525  ;;  %v208_v62 = vmul.f32 0.5, %v1524_v58  ;;  %v1882_v63 = vadd.f32 0.5, %v206_v56  ;;  %236 = vst [vmem:[#allocation2 + $0x10] sm:$0xff] %v1878_v57  ;;  %1551 = vtanh.f32 %v271_v44  ;;  %v276_v56 = vmul.f32 0.5, %v260_v47  ;;  %v264_v58 = vld [vmem:[#allocation2 + $0xe8] sm:$0xff] }
  0x5e   : > { %v1528_v0 = vpop.eup %1527  ;;  %v209_v1 = vmul.f32 0.5, %v1526_v61  ;;  %v1885_v2 = vadd.f32 0.5, %v207_v59  ;;  %237 = vst [vmem:[#allocation2 + $0x18] sm:$0xff] %v1880_v60  ;;  %1553 = vtanh.f32 %v272_v46  ;;  %v277_v59 = vmul.f32 0.5, %v261_v51  ;;  %v265_v61 = vld [vmem:[#allocation2 + $0xf0] sm:$0xff] }
  0x5f   : > { %v1530_v3 = vpop.eup %1529  ;;  %v210_v4 = vmul.f32 0.5, %v1528_v0  ;;  %v1888_v5 = vadd.f32 0.5, %v208_v62  ;;  %238 = vst [vmem:[#allocation2 + $0x20] sm:$0xff] %v1882_v63  ;;  %1555 = vtanh.f32 %v273_v49  ;;  %v278_v62 = vmul.f32 0.5, %v262_v53  ;;  %v266_v0 = vld [vmem:[#allocation2 + $0xf8] sm:$0xff] }
  0x60   : > { %v1532_v6 = vpop.eup %1531  ;;  %v211_v7 = vmul.f32 0.5, %v1530_v3  ;;  %v1891_v8 = vadd.f32 0.5, %v209_v1  ;;  %239 = vst [vmem:[#allocation2 + $0x28] sm:$0xff] %v1885_v2  ;;  %1557 = vtanh.f32 %v274_v52  ;;  %v279_v1 = vmul.f32 0.5, %v263_v55 }
  0x61   : > { %v1534_v9 = vpop.eup %1533  ;;  %v212_v10 = vmul.f32 0.5, %v1532_v6  ;;  %v1894_v11 = vadd.f32 0.5, %v210_v4  ;;  %240 = vst [vmem:[#allocation2 + $0x30] sm:$0xff] %v1888_v5  ;;  %1559 = vtanh.f32 %v275_v54  ;;  %v280_v3 = vmul.f32 0.5, %v264_v58 }
  0x62   : > { %v1536_v12 = vpop.eup %1535  ;;  %v213_v13 = vmul.f32 0.5, %v1534_v9  ;;  %v1897_v16 = vadd.f32 0.5, %v211_v7  ;;  %241 = vst [vmem:[#allocation2 + $0x38] sm:$0xff] %v1891_v8  ;;  %1561 = vtanh.f32 %v276_v56  ;;  %v281_v4 = vmul.f32 0.5, %v265_v61 }
  0x63   : > { %v1538_v17 = vpop.eup %1537  ;;  %v214_v18 = vmul.f32 0.5, %v1536_v12  ;;  %v1900_v21 = vadd.f32 0.5, %v212_v10  ;;  %242 = vst [vmem:[#allocation2 + $0x40] sm:$0xff] %v1894_v11  ;;  %1563 = vtanh.f32 %v277_v59  ;;  %v282_v6 = vmul.f32 0.5, %v266_v0 }
  0x64   : > { %v1540_v22 = vpop.eup %1539  ;;  %v215_v23 = vmul.f32 0.5, %v1538_v17  ;;  %v1903_v24 = vadd.f32 0.5, %v213_v13  ;;  %243 = vst [vmem:[#allocation2 + $0x48] sm:$0xff] %v1897_v16  ;;  %1565 = vtanh.f32 %v278_v62 }
  0x65   : > { %v1542_v25 = vpop.eup %1541  ;;  %v216_v26 = vmul.f32 0.5, %v1540_v22  ;;  %v1906_v27 = vadd.f32 0.5, %v214_v18  ;;  %244 = vst [vmem:[#allocation2 + $0x50] sm:$0xff] %v1900_v21  ;;  %1567 = vtanh.f32 %v279_v1 }
  0x66   : > { %v217_v28 = vmul.f32 0.5, %v1542_v25  ;;  %v1909_v29 = vadd.f32 0.5, %v215_v23  ;;  %245 = vst [vmem:[#allocation2 + $0x58] sm:$0xff] %v1903_v24  ;;  %v1544_v7 = vpop.eup %1543  ;;  %1569 = vtanh.f32 %v280_v3 }
  0x67   : > { %v1912_v30 = vadd.f32 0.5, %v216_v26  ;;  %246 = vst [vmem:[#allocation2 + $0x60] sm:$0xff] %v1906_v27  ;;  %v1546_v9 = vpop.eup %1545  ;;  %1571 = vtanh.f32 %v281_v4  ;;  %v299_v10 = vmul.f32 0.5, %v1544_v7 }
  0x68   : > { %v1915_v31 = vadd.f32 0.5, %v217_v28  ;;  %247 = vst [vmem:[#allocation2 + $0x68] sm:$0xff] %v1909_v29  ;;  %v1548_v12 = vpop.eup %1547  ;;  %1573 = vtanh.f32 %v282_v6  ;;  %v300_v13 = vmul.f32 0.5, %v1546_v9 }
  0x69   : > { %248 = vst [vmem:[#allocation2 + $0x70] sm:$0xff] %v1912_v30  ;;  %v1550_v17 = vpop.eup %1549  ;;  %v301_v18 = vmul.f32 0.5, %v1548_v12  ;;  %v1920_v22 = vadd.f32 0.5, %v299_v10 }
  0x6a   : > { %249 = vst [vmem:[#allocation2 + $0x78] sm:$0xff] %v1915_v31  ;;  %v1552_v23 = vpop.eup %1551  ;;  %v302_v25 = vmul.f32 0.5, %v1550_v17  ;;  %v1922_v26 = vadd.f32 0.5, %v300_v13  ;;  %v365_v13 = vrot.slane %v1856_v14, 1  ;;  %v406_v17 = vsub.f32 1.0, %v1856_v14 }
  0x6b   : > { %2706 = vst [vmem:[#allocation15_spill] sm:$0xff] %v1920_v22  ;;  %v1554_v28 = vpop.eup %1553  ;;  %v303_v32 = vmul.f32 0.5, %v1552_v23  ;;  %v1924_v33 = vadd.f32 0.5, %v301_v18  ;;  %331 = vst [vmem:[#allocation2 + $0x80] sm:$0xff] %v1920_v22  ;;  %v363_v18 = vrot.slane %v1858_v15, 1  ;;  %v1972_v23 = vrot.slane %v1864_v19, 1 }
  0x6c   : > { %2707 = vst [vmem:[#allocation16_spill] sm:$0xff] %v1922_v26  ;;  %v1556_v34 = vpop.eup %1555  ;;  %v304_v35 = vmul.f32 0.5, %v1554_v28  ;;  %v1927_v36 = vadd.f32 0.5, %v302_v25  ;;  %332 = vst [vmem:[#allocation2 + $0x88] sm:$0xff] %v1922_v26  ;;  %v430_v25 = vsub.f32 1.0, %v365_v13 }
  0x6d   : > { %2708 = vst [vmem:[#allocation17_spill] sm:$0xff] %v1924_v33  ;;  %v1558_v37 = vpop.eup %1557  ;;  %v305_v38 = vmul.f32 0.5, %v1556_v34  ;;  %v1930_v39 = vadd.f32 0.5, %v303_v32  ;;  %333 = vst [vmem:[#allocation2 + $0x90] sm:$0xff] %v1924_v33  ;;  %v404_v34 = vsub.f32 1.0, %v1858_v15 }
  0x6e   : > { %2709 = vst [vmem:[#allocation18_spill] sm:$0xff] %v1927_v36  ;;  %v1560_v40 = vpop.eup %1559  ;;  %v306_v41 = vmul.f32 0.5, %v1558_v37  ;;  %v1933_v42 = vadd.f32 0.5, %v304_v35  ;;  %334 = vst [vmem:[#allocation2 + $0x98] sm:$0xff] %v1927_v36 }
  0x6f   : > { %2710 = vst [vmem:[#allocation19_spill] sm:$0xff] %v1930_v39  ;;  %v1562_v43 = vpop.eup %1561  ;;  %v307_v44 = vmul.f32 0.5, %v1560_v40  ;;  %v1936_v45 = vadd.f32 0.5, %v305_v38  ;;  %335 = vst [vmem:[#allocation2 + $0xa0] sm:$0xff] %v1930_v39 }
  0x70   : > { %2711 = vst [vmem:[#allocation20_spill] sm:$0xff] %v1933_v42  ;;  %v1564_v46 = vpop.eup %1563  ;;  %v308_v47 = vmul.f32 0.5, %v1562_v43  ;;  %v1939_v49 = vadd.f32 0.5, %v306_v41  ;;  %336 = vst [vmem:[#allocation2 + $0xa8] sm:$0xff] %v1933_v42  ;;  %v428_v41 = vsub.f32 1.0, %v363_v18 }
  0x71   : > { %2712 = vst [vmem:[#allocation21_spill] sm:$0xff] %v1936_v45  ;;  %v1566_v51 = vpop.eup %1565  ;;  %v309_v52 = vmul.f32 0.5, %v1564_v46  ;;  %v1942_v53 = vadd.f32 0.5, %v307_v44  ;;  %337 = vst [vmem:[#allocation2 + $0xb0] sm:$0xff] %v1936_v45 }
  0x72   : > { %2713 = vst [vmem:[#allocation22_spill] sm:$0xff] %v1939_v49  ;;  %v1568_v54 = vpop.eup %1567  ;;  %v310_v55 = vmul.f32 0.5, %v1566_v51  ;;  %v1945_v56 = vadd.f32 0.5, %v308_v47  ;;  %338 = vst [vmem:[#allocation2 + $0xb8] sm:$0xff] %v1939_v49 }
  0x73   : > { %2714 = vst [vmem:[#allocation23_spill] sm:$0xff] %v1942_v53  ;;  %v1570_v58 = vpop.eup %1569  ;;  %v311_v59 = vmul.f32 0.5, %v1568_v54  ;;  %v1948_v61 = vadd.f32 0.5, %v309_v52  ;;  %339 = vst [vmem:[#allocation2 + $0xc0] sm:$0xff] %v1942_v53 }
  0x74   : > { %2715 = vst [vmem:[#allocation24_spill] sm:$0xff] %v1945_v56  ;;  %v1572_v62 = vpop.eup %1571  ;;  %v312_v0 = vmul.f32 0.5, %v1570_v58  ;;  %v1951_v1 = vadd.f32 0.5, %v310_v55  ;;  %340 = vst [vmem:[#allocation2 + $0xc8] sm:$0xff] %v1945_v56 }
  0x75   : > { %2716 = vst [vmem:[#allocation25_spill] sm:$0xff] %v1948_v61  ;;  %v1574_v3 = vpop.eup %1573  ;;  %v313_v4 = vmul.f32 0.5, %v1572_v62  ;;  %v1954_v6 = vadd.f32 0.5, %v311_v59  ;;  %341 = vst [vmem:[#allocation2 + $0xd0] sm:$0xff] %v1948_v61 }
  0x76   : > { %2717 = vst [vmem:[#allocation26_spill] sm:$0xff] %v1951_v1  ;;  %v314_v7 = vmul.f32 0.5, %v1574_v3  ;;  %v1957_v9 = vadd.f32 0.5, %v312_v0  ;;  %342 = vst [vmem:[#allocation2 + $0xd8] sm:$0xff] %v1951_v1 }
  0x77   : > { %2718 = vst [vmem:[#allocation27_spill] sm:$0xff] %v1954_v6  ;;  %v1960_v10 = vadd.f32 0.5, %v313_v4  ;;  %343 = vst [vmem:[#allocation2 + $0xe0] sm:$0xff] %v1954_v6 }
  0x78   : > { %2719 = vst [vmem:[#allocation28_spill] sm:$0xff] %v1957_v9  ;;  %v1963_v12 = vadd.f32 0.5, %v314_v7  ;;  %344 = vst [vmem:[#allocation2 + $0xe8] sm:$0xff] %v1957_v9 }
  0x79   : > { %2720 = vst [vmem:[#allocation29_spill] sm:$0xff] %v1960_v10  ;;  %345 = vst [vmem:[#allocation2 + $0xf0] sm:$0xff] %v1960_v10 }
  0x7a   : > { %2721 = vst [vmem:[#allocation30_spill] sm:$0xff] %v1963_v12  ;;  %346 = vst [vmem:[#allocation2 + $0xf8] sm:$0xff] %v1963_v12 }
  0x7b   : > { %2722 = vst [vmem:[#allocation31_spill] sm:$0xff] %v1972_v23 }
  0xbc   : > { %v381_v28 = vpop.permute.xlu1 %380  ;;  %v1974_v32 = vpop.permute.xlu0 %376 }
  0xbd   : > { %v394_v35 = vrot.slane %v381_v28, 1  ;;  %v410_v37 = vsub.f32 1.0, %v381_v28  ;;  %v418_v38 = vmul.f32 %v406_v17, %v381_v28  ;;  %v392_v40 = vrot.slane %v1974_v32, 1 }
  0xbe   : > { %v426_v44 = vmul.f32 %v381_v28, %v1856_v14  ;;  %v1982_v55 = vmul.f32 %v404_v34, %v1974_v32 }
  0xbf   : > { %v434_v46 = vsub.f32 1.0, %v394_v35  ;;  %v442_v47 = vmul.f32 %v430_v25, %v394_v35  ;;  %v414_v52 = vmul.f32 %v410_v37, %v406_v17  ;;  %v450_v54 = vmul.f32 %v394_v35, %v365_v13 }
  0xc0   : > { %v432_v58 = vsub.f32 1.0, %v392_v40  ;;  %v440_v23 = vmul.f32 %v428_v41, %v392_v40 }
  0xc1   : > { %v438_v59 = vmul.f32 %v434_v46, %v430_v25  ;;  %v446_v62 = vmul.f32 %v434_v46, %v365_v13  ;;  %v474_v0 = vmul.f32 %v442_v47, %v1874_v50  ;;  %v506_v3 = vmul.f32 %v442_v47, %v1885_v2 }
  0xc2   : > { %v482_v4 = vmul.f32 %v450_v54, %v1880_v60  ;;  %v514_v7 = vmul.f32 %v450_v54, %v1891_v8  ;;  %v538_v28 = vmul.f32 %v442_v47, %v1897_v16  ;;  %v546_v43 = vmul.f32 %v450_v54, %v1903_v24 }
  0xc3   : > { %v470_v17 = vmul.f32 %v438_v59, %v1872_v48  ;;  %v478_v35 = vmul.f32 %v446_v62, %v1878_v57  ;;  %v502_v51 = vmul.f32 %v438_v59, %v1882_v63  ;;  %v510_v13 = vmul.f32 %v446_v62, %v1888_v5 }
  0xc4   : > { %v534_v25 = vmul.f32 %v438_v59, %v1894_v11  ;;  %v542_v46 = vmul.f32 %v446_v62, %v1900_v21  ;;  %v566_v12 = vmul.f32 %v438_v59, %v1906_v27  ;;  %v570_v10 = vmul.f32 %v442_v47, %v1909_v29 }
  0xc5   : > { %v486_v9 = vadd.f32 %v474_v0, %v470_v17  ;;  %v490_v6 = vadd.f32 %v482_v4, %v478_v35  ;;  %v518_v61 = vadd.f32 %v506_v3, %v502_v51  ;;  %v522_v53 = vadd.f32 %v514_v7, %v510_v13 }
  0xc6   : > { %v550_v45 = vadd.f32 %v538_v28, %v534_v25  ;;  %v554_v39 = vadd.f32 %v546_v43, %v542_v46  ;;  %v574_v33 = vmul.f32 %v446_v62, %v1912_v30  ;;  %v578_v22 = vmul.f32 %v450_v54, %v1915_v31 }
  0xc7   : > { %v494_v1 = vadd.f32 %v490_v6, %v486_v9  ;;  %v526_v56 = vadd.f32 %v522_v53, %v518_v61  ;;  %v582_v49 = vadd.f32 %v570_v10, %v566_v12  ;;  %v436_v36 = vmul.f32 %v432_v58, %v428_v41 }
  0xc8   : > { %v558_v42 = vadd.f32 %v554_v39, %v550_v45  ;;  %v586_v26 = vadd.f32 %v578_v22, %v574_v33  ;;  %v444_v59 = vmul.f32 %v432_v58, %v363_v18  ;;  %v422_v47 = vmul.f32 %v410_v37, %v1856_v14  ;;  %v2015_v37 = vpop.permute.xlu1 %382 }
  0xc9   : > { %v2723_v0 = vsub.f32 1.0, %v1974_v32  ;;  %v448_v3 = vmul.f32 %v392_v40, %v363_v18  ;;  %v468_v43 = vmul.f32 %v436_v36, %v1872_v48  ;;  %v498_v4 = vmul.f32 %v494_v1, %v414_v52 }
  0xca   : > { %v590_v62 = vadd.f32 %v586_v26, %v582_v49  ;;  %v472_v54 = vmul.f32 %v440_v23, %v1874_v50  ;;  %v476_v53 = vmul.f32 %v444_v59, %v1878_v57  ;;  %v530_v61 = vmul.f32 %v526_v56, %v418_v38 }
  0xcb   : > { %v412_v51 = vmul.f32 %v2723_v0, %v404_v34  ;;  %v480_v39 = vmul.f32 %v448_v3, %v1880_v60  ;;  %v500_v22 = vmul.f32 %v436_v36, %v1882_v63  ;;  %v504_v33 = vmul.f32 %v440_v23, %v1885_v2 }
  0xcc   : > { %v562_v14 = vmul.f32 %v558_v42, %v422_v47  ;;  %v484_v45 = vadd.f32 %v472_v54, %v468_v43  ;;  %v508_v6 = vmul.f32 %v444_v59, %v1888_v5  ;;  %v512_v9 = vmul.f32 %v448_v3, %v1891_v8 }
  0xcd   : > { %v488_v10 = vadd.f32 %v480_v39, %v476_v53  ;;  %v516_v1 = vadd.f32 %v504_v33, %v500_v22  ;;  %v532_v26 = vmul.f32 %v436_v36, %v1894_v11  ;;  %v536_v49 = vmul.f32 %v440_v23, %v1897_v16 }
  0xce   : > { %v594_v12 = vmul.f32 %v590_v62, %v426_v44  ;;  %v520_v56 = vadd.f32 %v512_v9, %v508_v6  ;;  %v540_v18 = vmul.f32 %v444_v59, %v1900_v21  ;;  %v544_v34 = vmul.f32 %v448_v3, %v1903_v24 }
  0xcf   : > { %v492_v42 = vadd.f32 %v488_v10, %v484_v45  ;;  %v548_v38 = vadd.f32 %v536_v49, %v532_v26  ;;  %v564_v40 = vmul.f32 %v436_v36, %v1906_v27  ;;  %v568_v41 = vmul.f32 %v440_v23, %v1909_v29 }
  0xd0   : > { %v2724_v52 = vmov %v2723_v0  ;;  %v524_v7 = vadd.f32 %v520_v56, %v516_v1  ;;  %v552_v28 = vadd.f32 %v544_v34, %v540_v18  ;;  %v572_v44 = vmul.f32 %v444_v59, %v1912_v30  ;;  %v2044_v56 = vpop.permute.xlu0 %378 }
  0xd1   : > { %v420_v58 = vmul.f32 %v2724_v52, %v1858_v15  ;;  %v598_v17 = vadd.f32 %v530_v61, %v498_v4  ;;  %v576_v35 = vmul.f32 %v448_v3, %v1915_v31  ;;  %v580_v13 = vadd.f32 %v568_v41, %v564_v40  ;;  %v2725_v3 = vld [vmem:[#allocation31_spill] sm:$0xff] }
  0xd2   : > { %v395_v25 = vrot.slane %v2015_v37, 1  ;;  %v602_v46 = vadd.f32 %v594_v12, %v562_v14  ;;  %v496_v47 = vmul.f32 %v492_v42, %v412_v51  ;;  %v528_v36 = vmul.f32 %v524_v7, %v1982_v55 }
  0xd3   : > { %v556_v0 = vadd.f32 %v552_v28, %v548_v38  ;;  %v584_v23 = vadd.f32 %v576_v35, %v572_v44  ;;  %v424_v62 = vmul.f32 %v1974_v32, %v1858_v15  ;;  %v407_v53 = vsub.f32 1.0, %v1864_v19 }
  0xd4   : > { %v435_v43 = vsub.f32 1.0, %v395_v25  ;;  %v364_v59 = vrot.slane %v1866_v20, 1  ;;  %v2726_v61 = vsub.f32 1.0, %v2725_v3  ;;  %v606_v33 = vadd.f32 %v602_v46, %v598_v17 }
  0xd5   : > { %v560_v54 = vmul.f32 %v556_v0, %v420_v58  ;;  %v588_v4 = vadd.f32 %v584_v23, %v580_v13  ;;  %v596_v14 = vadd.f32 %v528_v36, %v496_v47  ;;  %v451_v45 = vmul.f32 %v395_v25, %v2725_v3 }
  0xd6   : > { %v439_v39 = vmul.f32 %v435_v43, %v2726_v61  ;;  %v2727_v22 = vmov %v2726_v61  ;;  %v447_v55 = vmul.f32 %v435_v43, %v2725_v3  ;;  %v405_v15 = vsub.f32 1.0, %v1866_v20 }
  0xd7   : > { %v443_v51 = vmul.f32 %v2727_v22, %v395_v25  ;;  %v592_v32 = vmul.f32 %v588_v4, %v424_v62  ;;  %v483_v1 = vmul.f32 %v451_v45, %v1880_v60  ;;  %v515_v34 = vmul.f32 %v451_v45, %v1891_v8 }
  0xd8   : > { %v471_v6 = vmul.f32 %v439_v39, %v1872_v48  ;;  %v479_v10 = vmul.f32 %v447_v55, %v1878_v57  ;;  %v503_v26 = vmul.f32 %v439_v39, %v1882_v63  ;;  %v511_v12 = vmul.f32 %v447_v55, %v1888_v5 }
  0xd9   : > { %v475_v9 = vmul.f32 %v443_v51, %v1874_v50  ;;  %v507_v49 = vmul.f32 %v443_v51, %v1885_v2  ;;  %v600_v18 = vadd.f32 %v592_v32, %v560_v54  ;;  %v535_v42 = vmul.f32 %v439_v39, %v1894_v11 }
  0xda   : > { %v429_v38 = vsub.f32 1.0, %v364_v59  ;;  %v610_v40 = vmax.f32 %v606_v33, 0.0  ;;  %v411_v41 = vsub.f32 1.0, %v2015_v37  ;;  %v539_v52 = vmul.f32 %v443_v51, %v1897_v16 }
  0xdb   : > { %v543_v58 = vmul.f32 %v447_v55, %v1900_v21  ;;  %v604_v7 = vadd.f32 %v600_v18, %v596_v14  ;;  %v487_v28 = vadd.f32 %v475_v9, %v471_v6  ;;  %v547_v44 = vmul.f32 %v451_v45, %v1903_v24 }
  0xdc   : > { %v393_v17 = vrot.slane %v2044_v56, 1  ;;  %v491_v35 = vadd.f32 %v483_v1, %v479_v10  ;;  %v519_v13 = vadd.f32 %v507_v49, %v503_v26  ;;  %v523_v25 = vadd.f32 %v515_v34, %v511_v12 }
  0xdd   : > { %v567_v46 = vmul.f32 %v439_v39, %v1906_v27  ;;  %v608_v47 = vmax.f32 %v604_v7, 0.0  ;;  %v551_v36 = vadd.f32 %v539_v52, %v535_v42  ;;  %v555_v0 = vadd.f32 %v547_v44, %v543_v58 }
  0xde   : > { %v571_v23 = vmul.f32 %v443_v51, %v1909_v29  ;;  %v419_v43 = vmul.f32 %v407_v53, %v2015_v37  ;;  %v427_v62 = vmul.f32 %v2015_v37, %v1864_v19  ;;  %v575_v54 = vmul.f32 %v447_v55, %v1912_v30 }
  0xdf   : > { %v579_v4 = vmul.f32 %v451_v45, %v1915_v31  ;;  %v415_v3 = vmul.f32 %v411_v41, %v407_v53  ;;  %v423_v61 = vmul.f32 %v411_v41, %v1864_v19  ;;  %v409_v22 = vsub.f32 1.0, %v2044_v56 }
  0xe0   : > { %v417_v39 = vmul.f32 %v405_v15, %v2044_v56  ;;  %v433_v33 = vsub.f32 1.0, %v393_v17  ;;  %v441_v51 = vmul.f32 %v429_v38, %v393_v17  ;;  %v449_v14 = vmul.f32 %v393_v17, %v364_v59 }
  0xe1   : > { %v2065_v32 = vmin.f32 %v608_v47, 1.0  ;;  %v495_v6 = vadd.f32 %v491_v35, %v487_v28  ;;  %v527_v37 = vadd.f32 %v523_v25, %v519_v13  ;;  %v559_v9 = vadd.f32 %v555_v0, %v551_v36 }
  0xe2   : > { %v583_v55 = vadd.f32 %v571_v23, %v567_v46  ;;  %v587_v10 = vadd.f32 %v579_v4, %v575_v54  ;;  %v437_v45 = vmul.f32 %v433_v33, %v429_v38  ;;  %v445_v53 = vmul.f32 %v433_v33, %v364_v59 }
  0xe3   : > { %632 = vrot.lane.b32.xlu0 %v2065_v32, %s1727_s20  ;;  %v2069_v19 = vmin.f32 %v610_v40, 1.0  ;;  %v473_v1 = vmul.f32 %v441_v51, %v1874_v50  ;;  %v481_v26 = vmul.f32 %v449_v14, %v1880_v60  ;;  %v505_v49 = vmul.f32 %v441_v51, %v1885_v2 }
  0xe4   : > { %v513_v12 = vmul.f32 %v449_v14, %v1891_v8  ;;  %v469_v18 = vmul.f32 %v437_v45, %v1872_v48  ;;  %v477_v34 = vmul.f32 %v445_v53, %v1878_v57  ;;  %v501_v42 = vmul.f32 %v437_v45, %v1882_v63 }
  0xe5   : > { %v509_v59 = vmul.f32 %v445_v53, %v1888_v5  ;;  %v533_v38 = vmul.f32 %v437_v45, %v1894_v11  ;;  %v537_v40 = vmul.f32 %v441_v51, %v1897_v16  ;;  %v541_v50 = vmul.f32 %v445_v53, %v1900_v21 }
  0xe6   : > { %v545_v60 = vmul.f32 %v449_v14, %v1903_v24  ;;  %v485_v41 = vadd.f32 %v473_v1, %v469_v18  ;;  %v489_v2 = vadd.f32 %v481_v26, %v477_v34  ;;  %v517_v52 = vadd.f32 %v505_v49, %v501_v42  ;;  %v2728_v42 = vld [vmem:[#allocation16_spill] sm:$0xff] }
  0xe7   : > { %v521_v8 = vadd.f32 %v513_v12, %v509_v59  ;;  %636 = vrot.lane.b32.xlu0 %v2069_v19, %s1727_s20  ;;  %v591_v48 = vadd.f32 %v587_v10, %v583_v55  ;;  %v549_v57 = vadd.f32 %v537_v40, %v533_v38  ;;  %v565_v5 = vmul.f32 %v437_v45, %v1906_v27  ;;  %v2729_v38 = vld [vmem:[#allocation20_spill] sm:$0xff] }
  0xe8   : > { %v553_v63 = vadd.f32 %v545_v60, %v541_v50  ;;  %v493_v58 = vadd.f32 %v489_v2, %v485_v41  ;;  %v569_v16 = vmul.f32 %v441_v51, %v1909_v29  ;;  %v573_v21 = vmul.f32 %v445_v53, %v1912_v30  ;;  %v2730_v50 = vld [vmem:[#allocation18_spill] sm:$0xff] }
  0xe9   : > { %v525_v11 = vadd.f32 %v521_v8, %v517_v52  ;;  %v499_v7 = vmul.f32 %v495_v6, %v415_v3  ;;  %v413_v24 = vmul.f32 %v409_v22, %v405_v15  ;;  %v577_v44 = vmul.f32 %v449_v14, %v1915_v31  ;;  %v2731_v41 = vld [vmem:[#allocation22_spill] sm:$0xff]  ;;  %v2732_v52 = vld [vmem:[#allocation24_spill] sm:$0xff] }
  0xea   : > { %v557_v28 = vadd.f32 %v553_v63, %v549_v57  ;;  %v531_v17 = vmul.f32 %v527_v37, %v419_v43  ;;  %v563_v35 = vmul.f32 %v559_v9, %v423_v61  ;;  %v421_v13 = vmul.f32 %v409_v22, %v1866_v20  ;;  %v2734_v63 = vld [vmem:[#allocation15_spill] sm:$0xff] }
  0xeb   : > { %v581_v25 = vadd.f32 %v569_v16, %v565_v5  ;;  %v595_v46 = vmul.f32 %v591_v48, %v427_v62  ;;  %v497_v27 = vmul.f32 %v493_v58, %v413_v24  ;;  %v529_v47 = vmul.f32 %v525_v11, %v417_v39  ;;  %v2733_v48 = vld [vmem:[#allocation26_spill] sm:$0xff]  ;;  %v2735_v58 = vld [vmem:[#allocation17_spill] sm:$0xff]  ;;  %v2736_v16 = vld [vmem:[#allocation19_spill] sm:$0xff] }
  0xec   : > { %v585_v36 = vadd.f32 %v577_v44, %v573_v21  ;;  %v425_v29 = vmul.f32 %v2044_v56, %v1866_v20  ;;  %v561_v30 = vmul.f32 %v557_v28, %v421_v13  ;;  %v599_v23 = vadd.f32 %v531_v17, %v499_v7  ;;  %v2737_v7 = vld [vmem:[#allocation21_spill] sm:$0xff]  ;;  %v2738_v28 = vld [vmem:[#allocation23_spill] sm:$0xff] }
  0xed   : > { %v603_v54 = vadd.f32 %v595_v46, %v563_v35  ;;  %v597_v4 = vadd.f32 %v529_v47, %v497_v27  ;;  %v620_v20 = vrot.slane %v2065_v32, 1  ;;  %v660_v6 = vsub.f32 1.0, %v2065_v32  ;;  %v2739_v17 = vld [vmem:[#allocation25_spill] sm:$0xff]  ;;  %v2740_v13 = vld [vmem:[#allocation27_spill] sm:$0xff]  ;;  %v2741_v46 = vld [vmem:[#allocation28_spill] sm:$0xff] }
  0xee   : > { %v589_v0 = vadd.f32 %v585_v36, %v581_v25  ;;  %v622_v37 = vrot.slane %v2069_v19, 1  ;;  %v662_v9 = vsub.f32 1.0, %v2069_v19 }
  0xef   : > { %v607_v31 = vadd.f32 %v603_v54, %v599_v23  ;;  %v684_v14 = vsub.f32 1.0, %v620_v20 }
  0xf0   : > { %v593_v15 = vmul.f32 %v589_v0, %v425_v29 }
  0xf1   : > { %v611_v33 = vmax.f32 %v607_v31, 0.0 }
  0xf2   : > { %v601_v3 = vadd.f32 %v593_v15, %v561_v30  ;;  %v2742_v15 = vld [vmem:[#allocation29_spill] sm:$0xff] }
  0xf3   : > { %v2098_v62 = vmin.f32 %v611_v33, 1.0 }
  0xf4   : > { %v605_v43 = vadd.f32 %v601_v3, %v597_v4  ;;  %v2743_v3 = vld [vmem:[#allocation30_spill] sm:$0xff] }
  0xf5   : > { %v2107_v45 = vrot.slane %v2098_v62, 1  ;;  %v663_v53 = vsub.f32 1.0, %v2098_v62 }
  0xf6   : > { %v609_v61 = vmax.f32 %v605_v43, 0.0 }
  0xf8   : > { %v2094_v22 = vmin.f32 %v609_v61, 1.0 }
  0xfa   : > { %634 = vrot.lane.b32.xlu1 %v2094_v22, %s1727_s20  ;;  %v2111_v12 = vrot.slane %v2094_v22, 1 }
  0xfe   : > { %638 = vrot.lane.b32.xlu1 %v2098_v62, %s1727_s20 }
 0x155   : > { %v633_v56 = vpop.permute.xlu0 %632 }
 0x156   : > { %v648_v39 = vrot.slane %v633_v56, 1  ;;  %v664_v51 = vsub.f32 1.0, %v633_v56  ;;  %v672_v26 = vmul.f32 %v660_v6, %v633_v56 }
 0x158   : > { %v688_v55 = vsub.f32 1.0, %v648_v39  ;;  %v696_v10 = vmul.f32 %v684_v14, %v648_v39  ;;  %v668_v1 = vmul.f32 %v664_v51, %v660_v6  ;;  %v704_v49 = vmul.f32 %v648_v39, %v620_v20 }
 0x159   : > { %v637_v47 = vpop.permute.xlu0 %636  ;;  %v676_v39 = vmul.f32 %v664_v51, %v2065_v32 }
 0x15a   : > { %v692_v18 = vmul.f32 %v688_v55, %v684_v14  ;;  %v700_v34 = vmul.f32 %v688_v55, %v620_v20  ;;  %v728_v59 = vmul.f32 %v696_v10, %v2728_v42  ;;  %v760_v40 = vmul.f32 %v696_v10, %v2729_v38 }
 0x15b   : > { %v736_v60 = vmul.f32 %v704_v49, %v2730_v50  ;;  %v768_v2 = vmul.f32 %v704_v49, %v2731_v41  ;;  %v792_v8 = vmul.f32 %v696_v10, %v2732_v52  ;;  %v800_v57 = vmul.f32 %v704_v49, %v2733_v48 }
 0x15c   : > { %v724_v5 = vmul.f32 %v692_v18, %v2734_v63  ;;  %v732_v11 = vmul.f32 %v700_v34, %v2735_v58  ;;  %v756_v21 = vmul.f32 %v692_v18, %v2736_v16  ;;  %v764_v24 = vmul.f32 %v700_v34, %v2737_v7 }
 0x15d   : > { %v788_v44 = vmul.f32 %v692_v18, %v2738_v28  ;;  %v796_v35 = vmul.f32 %v700_v34, %v2739_v17  ;;  %v820_v25 = vmul.f32 %v692_v18, %v2740_v13  ;;  %v824_v27 = vmul.f32 %v696_v10, %v2741_v46 }
 0x15e   : > { %v740_v36 = vadd.f32 %v728_v59, %v724_v5  ;;  %v744_v29 = vadd.f32 %v736_v60, %v732_v11  ;;  %v772_v30 = vadd.f32 %v760_v40, %v756_v21  ;;  %v776_v0 = vadd.f32 %v768_v2, %v764_v24 }
 0x15f   : > { %v804_v23 = vadd.f32 %v792_v8, %v788_v44  ;;  %v808_v54 = vadd.f32 %v800_v57, %v796_v35  ;;  %v828_v4 = vmul.f32 %v700_v34, %v2742_v15  ;;  %v832_v31 = vmul.f32 %v704_v49, %v2743_v3 }
 0x160   : > { %v748_v43 = vadd.f32 %v744_v29, %v740_v36  ;;  %v780_v61 = vadd.f32 %v776_v0, %v772_v30  ;;  %v836_v33 = vadd.f32 %v824_v27, %v820_v25  ;;  %v650_v20 = vrot.slane %v637_v47, 1 }
 0x161   : > { %v812_v14 = vadd.f32 %v808_v54, %v804_v23  ;;  %v840_v6 = vadd.f32 %v832_v31, %v828_v4  ;;  %v686_v55 = vsub.f32 1.0, %v622_v37  ;;  %v661_v59 = vsub.f32 1.0, %v2094_v22 }
 0x162   : > { %v752_v10 = vmul.f32 %v748_v43, %v668_v1  ;;  %v784_v18 = vmul.f32 %v780_v61, %v672_v26  ;;  %v690_v40 = vsub.f32 1.0, %v650_v20  ;;  %v680_v60 = vmul.f32 %v633_v56, %v2065_v32 }
 0x163   : > { %v816_v2 = vmul.f32 %v812_v14, %v676_v39  ;;  %v844_v34 = vadd.f32 %v840_v6, %v836_v33  ;;  %v685_v49 = vsub.f32 1.0, %v2111_v12  ;;  %v666_v8 = vsub.f32 1.0, %v637_v47 }
 0x164   : > { %v694_v57 = vmul.f32 %v690_v40, %v686_v55  ;;  %v698_v5 = vmul.f32 %v686_v55, %v650_v20  ;;  %v702_v11 = vmul.f32 %v690_v40, %v622_v37  ;;  %v852_v51 = vadd.f32 %v784_v18, %v752_v10 }
 0x165   : > { %v848_v21 = vmul.f32 %v844_v34, %v680_v60  ;;  %v674_v24 = vmul.f32 %v662_v9, %v637_v47  ;;  %v706_v1 = vmul.f32 %v650_v20, %v622_v37  ;;  %v2149_v43 = vmul.f32 %v637_v47, %v2069_v19 }
 0x166   : > { %v726_v26 = vmul.f32 %v694_v57, %v2734_v63  ;;  %v730_v44 = vmul.f32 %v698_v5, %v2728_v42  ;;  %v734_v32 = vmul.f32 %v702_v11, %v2735_v58  ;;  %v758_v56 = vmul.f32 %v694_v57, %v2736_v16 }
 0x167   : > { %v856_v35 = vadd.f32 %v848_v21, %v816_v2  ;;  %v738_v25 = vmul.f32 %v706_v1, %v2730_v50  ;;  %v762_v27 = vmul.f32 %v698_v5, %v2729_v38  ;;  %v766_v36 = vmul.f32 %v702_v11, %v2737_v7 }
 0x168   : > { %v742_v29 = vadd.f32 %v730_v44, %v726_v26  ;;  %v770_v30 = vmul.f32 %v706_v1, %v2731_v41  ;;  %v790_v37 = vmul.f32 %v694_v57, %v2738_v28  ;;  %v794_v0 = vmul.f32 %v698_v5, %v2732_v52 }
 0x169   : > { %v2145_v23 = vadd.f32 %v856_v35, %v852_v51  ;;  %v746_v54 = vadd.f32 %v738_v25, %v734_v32  ;;  %v774_v4 = vadd.f32 %v762_v27, %v758_v56  ;;  %v798_v31 = vmul.f32 %v702_v11, %v2739_v17 }
 0x16a   : > { %v778_v61 = vadd.f32 %v770_v30, %v766_v36  ;;  %v802_v33 = vmul.f32 %v706_v1, %v2733_v48  ;;  %v806_v20 = vadd.f32 %v794_v0, %v790_v37  ;;  %v670_v39 = vmul.f32 %v666_v8, %v662_v9 }
 0x16b   : > { %v678_v14 = vmul.f32 %v666_v8, %v2069_v19  ;;  %v750_v6 = vadd.f32 %v746_v54, %v742_v29  ;;  %v822_v55 = vmul.f32 %v694_v57, %v2740_v13  ;;  %v830_v47 = vmul.f32 %v702_v11, %v2742_v15 }
 0x16c   : > { %v635_v18 = vpop.permute.xlu1 %634  ;;  %v782_v40 = vadd.f32 %v778_v61, %v774_v4  ;;  %v810_v60 = vadd.f32 %v802_v33, %v798_v31  ;;  %v826_v21 = vmul.f32 %v698_v5, %v2741_v46  ;;  %v834_v51 = vmul.f32 %v706_v1, %v2743_v3 }
 0x16d   : > { %v649_v2 = vrot.slane %v635_v18, 1  ;;  %v665_v34 = vsub.f32 1.0, %v635_v18  ;;  %v673_v26 = vmul.f32 %v661_v59, %v635_v18  ;;  %v754_v9 = vmul.f32 %v750_v6, %v670_v39 }
 0x16e   : > { %v786_v44 = vmul.f32 %v782_v40, %v674_v24  ;;  %v814_v19 = vadd.f32 %v810_v60, %v806_v20  ;;  %v838_v56 = vadd.f32 %v826_v21, %v822_v55  ;;  %v842_v11 = vadd.f32 %v834_v51, %v830_v47 }
 0x16f   : > { %v669_v8 = vmul.f32 %v665_v34, %v661_v59  ;;  %v689_v32 = vsub.f32 1.0, %v649_v2  ;;  %v697_v57 = vmul.f32 %v685_v49, %v649_v2  ;;  %v677_v35 = vmul.f32 %v665_v34, %v2094_v22 }
 0x170   : > { %v705_v25 = vmul.f32 %v649_v2, %v2111_v12  ;;  %v818_v27 = vmul.f32 %v814_v19, %v678_v14  ;;  %v2177_v55 = vpop.permute.xlu1 %638  ;;  %v846_v19 = vadd.f32 %v842_v11, %v838_v56  ;;  %v854_v10 = vadd.f32 %v786_v44, %v754_v9 }
 0x171   : > { %v693_v36 = vmul.f32 %v689_v32, %v685_v49  ;;  %v701_v29 = vmul.f32 %v689_v32, %v2111_v12  ;;  %v729_v5 = vmul.f32 %v697_v57, %v2728_v42  ;;  %v761_v1 = vmul.f32 %v697_v57, %v2729_v38 }
 0x172   : > { %v737_v24 = vmul.f32 %v705_v25, %v2730_v50  ;;  %v769_v59 = vmul.f32 %v705_v25, %v2731_v41  ;;  %v793_v30 = vmul.f32 %v697_v57, %v2732_v52  ;;  %v801_v37 = vmul.f32 %v705_v25, %v2733_v48 }
 0x173   : > { %v725_v0 = vmul.f32 %v693_v36, %v2734_v63  ;;  %v733_v54 = vmul.f32 %v701_v29, %v2735_v58  ;;  %v757_v49 = vmul.f32 %v693_v36, %v2736_v16  ;;  %v765_v12 = vmul.f32 %v701_v29, %v2737_v7 }
 0x174   : > { %v789_v4 = vmul.f32 %v693_v36, %v2738_v28  ;;  %v797_v31 = vmul.f32 %v701_v29, %v2739_v17  ;;  %v821_v61 = vmul.f32 %v693_v36, %v2740_v13  ;;  %v825_v33 = vmul.f32 %v697_v57, %v2741_v46 }
 0x175   : > { %v741_v20 = vadd.f32 %v729_v5, %v725_v0  ;;  %v745_v39 = vadd.f32 %v737_v24, %v733_v54  ;;  %v773_v14 = vadd.f32 %v761_v1, %v757_v49  ;;  %v777_v6 = vadd.f32 %v769_v59, %v765_v12 }
 0x176   : > { %v805_v40 = vadd.f32 %v793_v30, %v789_v4  ;;  %v809_v60 = vadd.f32 %v801_v37, %v797_v31  ;;  %v829_v47 = vmul.f32 %v701_v29, %v2742_v15  ;;  %v833_v2 = vmul.f32 %v705_v25, %v2743_v3 }
 0x177   : > { %v749_v34 = vadd.f32 %v745_v39, %v741_v20  ;;  %v781_v21 = vadd.f32 %v777_v6, %v773_v14  ;;  %v837_v51 = vadd.f32 %v825_v33, %v821_v61  ;;  %v651_v57 = vrot.slane %v2177_v55, 1 }
 0x178   : > { %v813_v32 = vadd.f32 %v809_v60, %v805_v40  ;;  %v841_v36 = vadd.f32 %v833_v2, %v829_v47  ;;  %v850_v24 = vmul.f32 %v846_v19, %v2149_v43  ;;  %v667_v59 = vsub.f32 1.0, %v2177_v55 }
 0x179   : > { %v753_v5 = vmul.f32 %v749_v34, %v669_v8  ;;  %v785_v1 = vmul.f32 %v781_v21, %v673_v26  ;;  %v681_v30 = vmul.f32 %v635_v18, %v2094_v22  ;;  %v687_v25 = vsub.f32 1.0, %v2107_v45 }
 0x17a   : > { %v817_v29 = vmul.f32 %v813_v32, %v677_v35  ;;  %v845_v37 = vadd.f32 %v841_v36, %v837_v51  ;;  %v858_v54 = vadd.f32 %v850_v24, %v818_v27  ;;  %v675_v9 = vmul.f32 %v663_v53, %v2177_v55 }
 0x17b   : > { %v853_v0 = vadd.f32 %v785_v1, %v753_v5  ;;  %v691_v44 = vsub.f32 1.0, %v651_v57  ;;  %v699_v8 = vmul.f32 %v687_v25, %v651_v57  ;;  %v707_v26 = vmul.f32 %v651_v57, %v2107_v45 }
 0x17c   : > { %v849_v56 = vmul.f32 %v845_v37, %v681_v30  ;;  %v2744_v43 = vmax.f32 %v2145_v23, 0.0  ;;  %v862_v22 = vadd.f32 %v858_v54, %v854_v10  ;;  %v671_v18 = vmul.f32 %v667_v59, %v663_v53 }
 0x17d   : > { %v695_v35 = vmul.f32 %v691_v44, %v687_v25  ;;  %v703_v27 = vmul.f32 %v691_v44, %v2107_v45  ;;  %v731_v12 = vmul.f32 %v699_v8, %v2728_v42  ;;  %v739_v4 = vmul.f32 %v707_v26, %v2730_v50 }
 0x17e   : > { %v2192_v11 = vmin.f32 %v2744_v43, 1.0  ;;  %v857_v49 = vadd.f32 %v849_v56, %v817_v29  ;;  %v763_v31 = vmul.f32 %v699_v8, %v2729_v38  ;;  %v866_v23 = vmax.f32 %v862_v22, 0.0 }
 0x17f   : > { %v727_v61 = vmul.f32 %v695_v35, %v2734_v63  ;;  %v735_v10 = vmul.f32 %v703_v27, %v2735_v58  ;;  %v759_v53 = vmul.f32 %v695_v35, %v2736_v16  ;;  %v767_v45 = vmul.f32 %v703_v27, %v2737_v7 }
 0x180   : > { %888 = vrot.lane.b32.xlu0 %v2192_v11, %s1727_s20  ;;  %v861_v33 = vadd.f32 %v857_v49, %v853_v0  ;;  %v771_v20 = vmul.f32 %v707_v26, %v2731_v41  ;;  %v791_v42 = vmul.f32 %v695_v35, %v2738_v28  ;;  %v795_v14 = vmul.f32 %v699_v8, %v2732_v52 }
 0x181   : > { %v743_v50 = vadd.f32 %v731_v12, %v727_v61  ;;  %v747_v39 = vadd.f32 %v739_v4, %v735_v10  ;;  %v775_v38 = vadd.f32 %v763_v31, %v759_v53  ;;  %v799_v63 = vmul.f32 %v703_v27, %v2739_v17  ;;  %v2253_v31 = vld [vmem:[#allocation2 + $0x8] sm:$0xff]  ;;  %v2259_v53 = vld [vmem:[#allocation2 + $0x18] sm:$0xff] }
 0x182   : > { %v865_v6 = vmax.f32 %v861_v33, 0.0  ;;  %v779_v40 = vadd.f32 %v771_v20, %v767_v45  ;;  %v803_v58 = vmul.f32 %v707_v26, %v2733_v48  ;;  %v807_v16 = vadd.f32 %v795_v14, %v791_v42  ;;  %v2256_v61 = vld [vmem:[#allocation2 + $0x28] sm:$0xff]  ;;  %v2262_v45 = vld [vmem:[#allocation2 + $0x38] sm:$0xff]  ;;  %v2271_v14 = vld [vmem:[#allocation2] sm:$0xff] }
 0x183   : > { %v751_v60 = vadd.f32 %v747_v39, %v743_v50  ;;  %v823_v47 = vmul.f32 %v695_v35, %v2740_v13  ;;  %v827_v7 = vmul.f32 %v699_v8, %v2741_v46  ;;  %v831_v28 = vmul.f32 %v703_v27, %v2742_v15  ;;  %v2265_v42 = vld [vmem:[#allocation2 + $0x48] sm:$0xff]  ;;  %v2268_v39 = vld [vmem:[#allocation2 + $0x58] sm:$0xff] }
 0x184   : > { %v783_v41 = vadd.f32 %v779_v40, %v775_v38  ;;  %v811_v2 = vadd.f32 %v803_v58, %v799_v63  ;;  %v835_v34 = vmul.f32 %v707_v26, %v2743_v3  ;;  %v679_v52 = vmul.f32 %v667_v59, %v2098_v62  ;;  %v2274_v40 = vld [vmem:[#allocation2 + $0x10] sm:$0xff]  ;;  %v2277_v58 = vld [vmem:[#allocation2 + $0x20] sm:$0xff] }
 0x185   : > { %v839_v21 = vadd.f32 %v827_v7, %v823_v47  ;;  %v2216_v51 = vmin.f32 %v865_v6, 1.0  ;;  %v2218_v17 = vmin.f32 %v866_v23, 1.0  ;;  %v755_v48 = vmul.f32 %v751_v60, %v671_v18  ;;  %v2283_v7 = vld [vmem:[#allocation2 + $0x40] sm:$0xff] }
 0x186   : > { %v787_v19 = vmul.f32 %v783_v41, %v675_v9  ;;  %v815_v32 = vadd.f32 %v811_v2, %v807_v16  ;;  %v843_v36 = vadd.f32 %v835_v34, %v831_v28  ;;  %v683_v13 = vmul.f32 %v2177_v55, %v2098_v62  ;;  %v2280_v16 = vld [vmem:[#allocation2 + $0x30] sm:$0xff]  ;;  %v2289_v34 = vld [vmem:[#allocation2 + $0x60] sm:$0xff] }
 0x187   : > { %890 = vrot.lane.b32.xlu1 %v2216_v51, %s1727_s20  ;;  %892 = vrot.lane.b32.xlu0 %v2218_v17, %s1727_s20  ;;  %v876_v30 = vrot.slane %v2192_v11, 1  ;;  %v2232_v29 = vrot.slane %v2216_v51, 1  ;;  %v2235_v37 = vrot.slane %v2218_v17, 1  ;;  %v916_v54 = vsub.f32 1.0, %v2192_v11  ;;  %v2286_v2 = vld [vmem:[#allocation2 + $0x50] sm:$0xff] }
 0x188   : > { %v819_v46 = vmul.f32 %v815_v32, %v679_v52  ;;  %v847_v15 = vadd.f32 %v843_v36, %v839_v21  ;;  %v855_v57 = vadd.f32 %v787_v19, %v755_v48  ;;  %v917_v9 = vsub.f32 1.0, %v2216_v51  ;;  %v2292_v21 = vld [vmem:[#allocation2 + $0x68] sm:$0xff] }
 0x189   : > { %v940_v0 = vsub.f32 1.0, %v876_v30  ;;  %v941_v44 = vsub.f32 1.0, %v2232_v29  ;;  %v918_v56 = vsub.f32 1.0, %v2218_v17  ;;  %v942_v43 = vsub.f32 1.0, %v2235_v37 }
 0x18a   : > { %v851_v3 = vmul.f32 %v847_v15, %v683_v13 }
 0x18c   : > { %v859_v5 = vadd.f32 %v851_v3, %v819_v46 }
 0x18e   : > { %v863_v1 = vadd.f32 %v859_v5, %v855_v57  ;;  %v2295_v57 = vld [vmem:[#allocation2 + $0x70] sm:$0xff] }
 0x190   : > { %v867_v24 = vmax.f32 %v863_v1, 0.0  ;;  %v2298_v1 = vld [vmem:[#allocation2 + $0x78] sm:$0xff] }
 0x192   : > { %v2226_v59 = vmin.f32 %v867_v24, 1.0 }
 0x194   : > { %894 = vrot.lane.b32.xlu1 %v2226_v59, %s1727_s20  ;;  %v2247_v22 = vrot.slane %v2226_v59, 1  ;;  %v919_v49 = vsub.f32 1.0, %v2226_v59 }
 0x1f2   : > { %v2237_v62 = vpop.permute.xlu0 %888 }
 0x1f3   : > { %v904_v55 = vrot.slane %v2237_v62, 1  ;;  %v920_v25 = vsub.f32 1.0, %v2237_v62  ;;  %v928_v35 = vmul.f32 %v916_v54, %v2237_v62 }
 0x1f5   : > { %v944_v8 = vsub.f32 1.0, %v904_v55  ;;  %v952_v26 = vmul.f32 %v940_v0, %v904_v55  ;;  %v924_v18 = vmul.f32 %v920_v25, %v916_v54  ;;  %v960_v27 = vmul.f32 %v904_v55, %v876_v30 }
 0x1f7   : > { %v948_v12 = vmul.f32 %v944_v8, %v940_v0  ;;  %v956_v4 = vmul.f32 %v944_v8, %v876_v30  ;;  %v968_v23 = vmul.f32 %v2253_v31, %v952_v26  ;;  %v1000_v10 = vmul.f32 %v2256_v61, %v952_v26 }
 0x1f8   : > { %v976_v33 = vmul.f32 %v2259_v53, %v960_v27  ;;  %v1008_v20 = vmul.f32 %v2262_v45, %v960_v27  ;;  %v1032_v50 = vmul.f32 %v2265_v42, %v952_v26  ;;  %v1040_v38 = vmul.f32 %v2268_v39, %v960_v27 }
 0x1f9   : > { %v964_v6 = vmul.f32 %v2271_v14, %v948_v12  ;;  %v972_v63 = vmul.f32 %v2274_v40, %v956_v4  ;;  %v996_v60 = vmul.f32 %v2277_v58, %v948_v12  ;;  %v1004_v47 = vmul.f32 %v2280_v16, %v956_v4  ;;  %v891_v46 = vpop.permute.xlu1 %890 }
 0x1fa   : > { %v1028_v41 = vmul.f32 %v2283_v7, %v948_v12  ;;  %v1036_v28 = vmul.f32 %v2286_v2, %v956_v4  ;;  %v1060_v52 = vmul.f32 %v2289_v34, %v948_v12  ;;  %v1064_v48 = vmul.f32 %v2292_v21, %v952_v26 }
 0x1fb   : > { %v980_v19 = vadd.f32 %v968_v23, %v964_v6  ;;  %v984_v32 = vadd.f32 %v976_v33, %v972_v63  ;;  %v1012_v36 = vadd.f32 %v1000_v10, %v996_v60  ;;  %v1016_v13 = vadd.f32 %v1008_v20, %v1004_v47 }
 0x1fc   : > { %v1044_v15 = vadd.f32 %v1032_v50, %v1028_v41  ;;  %v1048_v3 = vadd.f32 %v1040_v38, %v1036_v28  ;;  %v1068_v5 = vmul.f32 %v2295_v57, %v956_v4  ;;  %v1072_v24 = vmul.f32 %v2298_v1, %v960_v27 }
 0x1fd   : > { %v988_v30 = vadd.f32 %v984_v32, %v980_v19  ;;  %v1020_v55 = vadd.f32 %v1016_v13, %v1012_v36  ;;  %v1076_v0 = vadd.f32 %v1064_v48, %v1060_v52  ;;  %v905_v54 = vrot.slane %v891_v46, 1 }
 0x1fe   : > { %v1052_v8 = vadd.f32 %v1048_v3, %v1044_v15  ;;  %v1080_v26 = vadd.f32 %v1072_v24, %v1068_v5  ;;  %v921_v12 = vsub.f32 1.0, %v891_v46  ;;  %v943_v23 = vsub.f32 1.0, %v2247_v22 }
 0x1ff   : > { %v932_v10 = vmul.f32 %v920_v25, %v2192_v11  ;;  %v992_v33 = vmul.f32 %v988_v30, %v924_v18  ;;  %v1024_v20 = vmul.f32 %v1020_v55, %v928_v35  ;;  %v945_v4 = vsub.f32 1.0, %v905_v54  ;;  %v2315_v18 = vpop.permute.xlu0 %892 }
 0x200   : > { %v936_v50 = vmul.f32 %v2237_v62, %v2192_v11  ;;  %v1084_v27 = vadd.f32 %v1080_v26, %v1076_v0  ;;  %v929_v38 = vmul.f32 %v917_v9, %v891_v46  ;;  %v937_v6 = vmul.f32 %v891_v46, %v2216_v51 }
 0x201   : > { %v1056_v63 = vmul.f32 %v1052_v8, %v932_v10  ;;  %v949_v60 = vmul.f32 %v945_v4, %v941_v44  ;;  %v953_v47 = vmul.f32 %v941_v44, %v905_v54  ;;  %v957_v25 = vmul.f32 %v945_v4, %v2232_v29 }
 0x202   : > { %v1088_v35 = vmul.f32 %v1084_v27, %v936_v50  ;;  %v1092_v41 = vadd.f32 %v1024_v20, %v992_v33  ;;  %v925_v11 = vmul.f32 %v921_v12, %v917_v9  ;;  %v961_v62 = vmul.f32 %v905_v54, %v2232_v29 }
 0x203   : > { %v965_v28 = vmul.f32 %v2271_v14, %v949_v60  ;;  %v969_v52 = vmul.f32 %v2253_v31, %v953_v47  ;;  %v973_v48 = vmul.f32 %v2274_v40, %v957_v25  ;;  %v997_v19 = vmul.f32 %v2277_v58, %v949_v60 }
 0x204   : > { %v977_v44 = vmul.f32 %v2259_v53, %v961_v62  ;;  %v1001_v32 = vmul.f32 %v2256_v61, %v953_v47  ;;  %v1005_v36 = vmul.f32 %v2280_v16, %v957_v25  ;;  %v922_v13 = vsub.f32 1.0, %v2315_v18 }
 0x205   : > { %v981_v46 = vadd.f32 %v969_v52, %v965_v28  ;;  %v1009_v9 = vmul.f32 %v2262_v45, %v961_v62  ;;  %v1029_v29 = vmul.f32 %v2283_v7, %v949_v60  ;;  %v1033_v15 = vmul.f32 %v2265_v42, %v953_v47 }
 0x206   : > { %v1096_v3 = vadd.f32 %v1088_v35, %v1056_v63  ;;  %v985_v5 = vadd.f32 %v977_v44, %v973_v48  ;;  %v1013_v24 = vadd.f32 %v1001_v32, %v997_v19  ;;  %v1037_v30 = vmul.f32 %v2286_v2, %v957_v25  ;;  %v2339_v35 = vpop.permute.xlu1 %894 }
 0x207   : > { %v1017_v55 = vadd.f32 %v1009_v9, %v1005_v36  ;;  %v1041_v0 = vmul.f32 %v2268_v39, %v961_v62  ;;  %v1045_v54 = vadd.f32 %v1033_v15, %v1029_v29  ;;  %v1061_v8 = vmul.f32 %v2289_v34, %v949_v60 }
 0x208   : > { %v989_v26 = vadd.f32 %v985_v5, %v981_v46  ;;  %v1065_v10 = vmul.f32 %v2292_v21, %v953_v47  ;;  %v1069_v33 = vmul.f32 %v2295_v57, %v957_v25  ;;  %v906_v20 = vrot.slane %v2315_v18, 1 }
 0x209   : > { %v933_v4 = vmul.f32 %v921_v12, %v2216_v51  ;;  %v1021_v50 = vadd.f32 %v1017_v55, %v1013_v24  ;;  %v1049_v27 = vadd.f32 %v1041_v0, %v1037_v30  ;;  %v1073_v63 = vmul.f32 %v2298_v1, %v961_v62 }
 0x20a   : > { %v1100_v28 = vadd.f32 %v1096_v3, %v1092_v41  ;;  %v993_v52 = vmul.f32 %v989_v26, %v925_v11  ;;  %v1077_v48 = vadd.f32 %v1065_v10, %v1061_v8  ;;  %v926_v60 = vmul.f32 %v922_v13, %v918_v56 }
 0x20b   : > { %v1025_v47 = vmul.f32 %v1021_v50, %v929_v38  ;;  %v1053_v25 = vadd.f32 %v1049_v27, %v1045_v54  ;;  %v1081_v19 = vadd.f32 %v1073_v63, %v1069_v33  ;;  %v930_v51 = vmul.f32 %v918_v56, %v2315_v18 }
 0x20c   : > { %v946_v12 = vsub.f32 1.0, %v906_v20  ;;  %v954_v62 = vmul.f32 %v942_v43, %v906_v20  ;;  %v962_v41 = vmul.f32 %v906_v20, %v2235_v37  ;;  %v907_v11 = vrot.slane %v2339_v35, 1 }
 0x20d   : > { %v1057_v44 = vmul.f32 %v1053_v25, %v933_v4  ;;  %v1085_v32 = vadd.f32 %v1081_v19, %v1077_v48  ;;  %v1093_v36 = vadd.f32 %v1025_v47, %v993_v52  ;;  %v923_v46 = vsub.f32 1.0, %v2339_v35 }
 0x20e   : > { %v950_v38 = vmul.f32 %v946_v12, %v942_v43  ;;  %v958_v9 = vmul.f32 %v946_v12, %v2235_v37  ;;  %v970_v56 = vmul.f32 %v2253_v31, %v954_v62  ;;  %v978_v29 = vmul.f32 %v2259_v53, %v962_v41 }
 0x20f   : > { %v1089_v15 = vmul.f32 %v1085_v32, %v937_v6  ;;  %v1002_v3 = vmul.f32 %v2256_v61, %v954_v62  ;;  %v1010_v5 = vmul.f32 %v2262_v45, %v962_v41  ;;  %v1034_v24 = vmul.f32 %v2265_v42, %v954_v62 }
 0x210   : > { %v966_v30 = vmul.f32 %v2271_v14, %v950_v38  ;;  %v974_v55 = vmul.f32 %v2274_v40, %v958_v9  ;;  %v998_v0 = vmul.f32 %v2277_v58, %v950_v38  ;;  %v1006_v43 = vmul.f32 %v2280_v16, %v958_v9 }
 0x211   : > { %v1097_v37 = vadd.f32 %v1089_v15, %v1057_v44  ;;  %v1030_v54 = vmul.f32 %v2283_v7, %v950_v38  ;;  %v1038_v8 = vmul.f32 %v2286_v2, %v958_v9  ;;  %v1042_v6 = vmul.f32 %v2268_v39, %v962_v41 }
 0x212   : > { %v982_v26 = vadd.f32 %v970_v56, %v966_v30  ;;  %v986_v10 = vadd.f32 %v978_v29, %v974_v55  ;;  %v1014_v33 = vadd.f32 %v1002_v3, %v998_v0  ;;  %v1018_v20 = vadd.f32 %v1010_v5, %v1006_v43 }
 0x213   : > { %v1101_v4 = vadd.f32 %v1097_v37, %v1093_v36  ;;  %v1046_v50 = vadd.f32 %v1034_v24, %v1030_v54  ;;  %v1050_v27 = vadd.f32 %v1042_v6, %v1038_v8  ;;  %v1062_v63 = vmul.f32 %v2289_v34, %v950_v38 }
 0x214   : > { %v990_v52 = vadd.f32 %v986_v10, %v982_v26  ;;  %v1022_v48 = vadd.f32 %v1018_v20, %v1014_v33  ;;  %v1066_v47 = vmul.f32 %v2292_v21, %v954_v62  ;;  %v1070_v25 = vmul.f32 %v2295_v57, %v958_v9 }
 0x215   : > { %v1104_v19 = vmax.f32 %v1100_v28, 0.0  ;;  %v1105_v12 = vmax.f32 %v1101_v4, 0.0  ;;  %v1054_v44 = vadd.f32 %v1050_v27, %v1046_v50  ;;  %v1074_v32 = vmul.f32 %v2298_v1, %v962_v41 }
 0x216   : > { %v934_v56 = vmul.f32 %v922_v13, %v2218_v17  ;;  %v994_v36 = vmul.f32 %v990_v52, %v926_v60  ;;  %v1026_v29 = vmul.f32 %v1022_v48, %v930_v51  ;;  %v1078_v15 = vadd.f32 %v1066_v47, %v1062_v63 }
 0x217   : > { %v938_v38 = vmul.f32 %v2315_v18, %v2218_v17  ;;  %v1082_v3 = vadd.f32 %v1074_v32, %v1070_v25  ;;  %v927_v28 = vmul.f32 %v923_v46, %v919_v49  ;;  %v947_v9 = vsub.f32 1.0, %v907_v11 }
 0x218   : > { %v1058_v62 = vmul.f32 %v1054_v44, %v934_v56  ;;  %v955_v41 = vmul.f32 %v943_v23, %v907_v11  ;;  %v963_v5 = vmul.f32 %v907_v11, %v2247_v22  ;;  %v1094_v60 = vadd.f32 %v1026_v29, %v994_v36 }
 0x219   : > { %v1086_v13 = vadd.f32 %v1082_v3, %v1078_v15  ;;  %v2384_v51 = vmin.f32 %v1104_v19, 1.0  ;;  %v2386_v24 = vmin.f32 %v1105_v12, 1.0  ;;  %v951_v17 = vmul.f32 %v947_v9, %v943_v23 }
 0x21a   : > { %v959_v18 = vmul.f32 %v947_v9, %v2247_v22  ;;  %v971_v30 = vmul.f32 %v2253_v31, %v955_v41  ;;  %v979_v55 = vmul.f32 %v2259_v53, %v963_v5  ;;  %v1003_v43 = vmul.f32 %v2256_v61, %v955_v41 }
 0x21b   : > { %v1090_v0 = vmul.f32 %v1086_v13, %v938_v38  ;;  %v1011_v11 = vmul.f32 %v2262_v45, %v963_v5  ;;  %v1035_v37 = vmul.f32 %v2265_v42, %v955_v41  ;;  %1128 = vrot.lane.b32.xlu0 %v2384_v51, %s1727_s20  ;;  %v967_v54 = vmul.f32 %v2271_v14, %v951_v17 }
 0x21c   : > { %v975_v23 = vmul.f32 %v2274_v40, %v959_v18  ;;  %v999_v22 = vmul.f32 %v2277_v58, %v951_v17  ;;  %v1007_v31 = vmul.f32 %v2280_v16, %v959_v18  ;;  %1130 = vrot.lane.b32.xlu1 %v2386_v24, %s1727_s20  ;;  %v1031_v61 = vmul.f32 %v2283_v7, %v951_v17 }
 0x21d   : > { %v1098_v53 = vadd.f32 %v1090_v0, %v1058_v62  ;;  %v1039_v45 = vmul.f32 %v2286_v2, %v959_v18  ;;  %v1043_v42 = vmul.f32 %v2268_v39, %v963_v5  ;;  %v983_v8 = vadd.f32 %v971_v30, %v967_v54 }
 0x21e   : > { %v987_v6 = vadd.f32 %v979_v55, %v975_v23  ;;  %v1015_v26 = vadd.f32 %v1003_v43, %v999_v22  ;;  %v1019_v14 = vadd.f32 %v1011_v11, %v1007_v31  ;;  %v1047_v40 = vadd.f32 %v1035_v37, %v1031_v61 }
 0x21f   : > { %v1102_v10 = vadd.f32 %v1098_v53, %v1094_v60  ;;  %v1051_v33 = vadd.f32 %v1043_v42, %v1039_v45  ;;  %v1063_v58 = vmul.f32 %v2289_v34, %v951_v17  ;;  %v1067_v4 = vmul.f32 %v2292_v21, %v955_v41  ;;  %v2460_v45 = vld [vmem:[#allocation2 + $0x88] sm:$0xff] }
 0x220   : > { %v991_v16 = vadd.f32 %v987_v6, %v983_v8  ;;  %v1023_v20 = vadd.f32 %v1019_v14, %v1015_v26  ;;  %v1071_v50 = vmul.f32 %v2295_v57, %v959_v18  ;;  %v931_v39 = vmul.f32 %v919_v49, %v2339_v35  ;;  %v2463_v8 = vld [vmem:[#allocation2 + $0xa8] sm:$0xff]  ;;  %v2469_v14 = vld [vmem:[#allocation2 + $0xb8] sm:$0xff] }
 0x221   : > { %v1106_v7 = vmax.f32 %v1102_v10, 0.0  ;;  %v1055_v2 = vadd.f32 %v1051_v33, %v1047_v40  ;;  %v1075_v27 = vmul.f32 %v2298_v1, %v963_v5  ;;  %v935_v63 = vmul.f32 %v923_v46, %v2226_v59  ;;  %v2472_v40 = vld [vmem:[#allocation2 + $0xc8] sm:$0xff] }
 0x222   : > { %v1079_v52 = vadd.f32 %v1067_v4, %v1063_v58  ;;  %v995_v34 = vmul.f32 %v991_v16, %v927_v28  ;;  %v1027_v48 = vmul.f32 %v1023_v20, %v931_v39  ;;  %v939_v21 = vmul.f32 %v2339_v35, %v2226_v59  ;;  %v2475_v58 = vld [vmem:[#allocation2 + $0xd8] sm:$0xff]  ;;  %v2478_v20 = vld [vmem:[#allocation2 + $0x80] sm:$0xff] }
 0x223   : > { %v1083_v47 = vadd.f32 %v1075_v27, %v1071_v50  ;;  %v2417_v25 = vmin.f32 %v1106_v7, 1.0  ;;  %v1059_v57 = vmul.f32 %v1055_v2, %v935_v63  ;;  %v1116_v56 = vrot.slane %v2384_v51, 1  ;;  %v2481_v50 = vld [vmem:[#allocation2 + $0x90] sm:$0xff]  ;;  %v2484_v39 = vld [vmem:[#allocation2 + $0xa0] sm:$0xff] }
 0x224   : > { %v1095_v1 = vadd.f32 %v1027_v48, %v995_v34  ;;  %v2429_v36 = vrot.slane %v2386_v24, 1  ;;  %v1156_v35 = vsub.f32 1.0, %v2384_v51  ;;  %v1157_v38 = vsub.f32 1.0, %v2386_v24  ;;  %v2487_v27 = vld [vmem:[#allocation2 + $0xb0] sm:$0xff] }
 0x225   : > { %v1087_v19 = vadd.f32 %v1083_v47, %v1079_v52  ;;  %1132 = vrot.lane.b32.xlu0 %v2417_v25, %s1727_s20  ;;  %v2432_v59 = vrot.slane %v2417_v25, 1  ;;  %v1180_v29 = vsub.f32 1.0, %v1116_v56  ;;  %v1158_v28 = vsub.f32 1.0, %v2417_v25  ;;  %v2490_v52 = vld [vmem:[#allocation2 + $0xc0] sm:$0xff]  ;;  %v2493_v48 = vld [vmem:[#allocation2 + $0xd0] sm:$0xff] }
 0x226   : > { %v1181_v3 = vsub.f32 1.0, %v2429_v36 }
 0x227   : > { %v1091_v49 = vmul.f32 %v1087_v19, %v939_v21  ;;  %v1182_v62 = vsub.f32 1.0, %v2432_v59  ;;  %v2496_v21 = vld [vmem:[#allocation2 + $0xe0] sm:$0xff]  ;;  %v2499_v19 = vld [vmem:[#allocation2 + $0xe8] sm:$0xff] }
 0x229   : > { %v1099_v12 = vadd.f32 %v1091_v49, %v1059_v57 }
 0x22b   : > { %v1103_v44 = vadd.f32 %v1099_v12, %v1095_v1 }
 0x22d   : > { %v1107_v32 = vmax.f32 %v1103_v44, 0.0 }
 0x22f   : > { %v2423_v46 = vmin.f32 %v1107_v32, 1.0 }
 0x231   : > { %1134 = vrot.lane.b32.xlu1 %v2423_v46, %s1727_s20  ;;  %v2444_v60 = vrot.slane %v2423_v46, 1 }
 0x28d   : > { %v1129_v15 = vpop.permute.xlu0 %1128 }
 0x28e   : > { %v1144_v9 = vrot.slane %v1129_v15, 1  ;;  %v1160_v41 = vsub.f32 1.0, %v1129_v15  ;;  %v2439_v5 = vmul.f32 %v1156_v35, %v1129_v15  ;;  %v2441_v13 = vpop.permute.xlu1 %1130  ;;  %v2447_v17 = vmul.f32 %v1129_v15, %v2384_v51 }
 0x28f   : > { %v1145_v18 = vrot.slane %v2441_v13, 1  ;;  %v1161_v30 = vsub.f32 1.0, %v2441_v13  ;;  %v2452_v55 = vmul.f32 %v1157_v38, %v2441_v13 }
 0x290   : > { %v1164_v0 = vmul.f32 %v1160_v41, %v1156_v35  ;;  %v1172_v43 = vmul.f32 %v1160_v41, %v2384_v51  ;;  %v1184_v11 = vsub.f32 1.0, %v1144_v9  ;;  %v1192_v37 = vmul.f32 %v1180_v29, %v1144_v9  ;;  %v2466_v51 = vld [vmem:[#allocation2 + $0x98] sm:$0xff] }
 0x291   : > { %v1200_v54 = vmul.f32 %v1144_v9, %v1116_v56  ;;  %v2455_v23 = vmul.f32 %v1161_v30, %v1157_v38  ;;  %v2458_v22 = vmul.f32 %v1161_v30, %v2386_v24  ;;  %v1185_v31 = vsub.f32 1.0, %v1145_v18  ;;  %v2505_v38 = vld [vmem:[#allocation2 + $0xf8] sm:$0xff] }
 0x292   : > { %v1188_v53 = vmul.f32 %v1184_v11, %v1180_v29  ;;  %v1196_v61 = vmul.f32 %v1184_v11, %v1116_v56  ;;  %v1208_v42 = vmul.f32 %v2460_v45, %v1192_v37  ;;  %v1240_v6 = vmul.f32 %v2463_v8, %v1192_v37  ;;  %v2502_v29 = vld [vmem:[#allocation2 + $0xf0] sm:$0xff] }
 0x293   : > { %v1216_v26 = vmul.f32 %v2466_v51, %v1200_v54  ;;  %v1248_v10 = vmul.f32 %v2469_v14, %v1200_v54  ;;  %v1272_v33 = vmul.f32 %v2472_v40, %v1192_v37  ;;  %v1280_v16 = vmul.f32 %v2475_v58, %v1200_v54 }
 0x294   : > { %v1204_v4 = vmul.f32 %v2478_v20, %v1188_v53  ;;  %v1212_v7 = vmul.f32 %v2481_v50, %v1196_v61  ;;  %v1236_v2 = vmul.f32 %v2484_v39, %v1188_v53  ;;  %v1244_v63 = vmul.f32 %v2487_v27, %v1196_v61 }
 0x295   : > { %v1268_v34 = vmul.f32 %v2490_v52, %v1188_v53  ;;  %v1276_v47 = vmul.f32 %v2493_v48, %v1196_v61  ;;  %v1300_v57 = vmul.f32 %v2496_v21, %v1188_v53  ;;  %v1304_v49 = vmul.f32 %v2499_v19, %v1192_v37 }
 0x296   : > { %v1220_v1 = vadd.f32 %v1208_v42, %v1204_v4  ;;  %v1224_v12 = vadd.f32 %v1216_v26, %v1212_v7  ;;  %v1252_v44 = vadd.f32 %v1240_v6, %v1236_v2  ;;  %v1256_v32 = vadd.f32 %v1248_v10, %v1244_v63 }
 0x297   : > { %v1284_v56 = vadd.f32 %v1272_v33, %v1268_v34  ;;  %v1288_v35 = vadd.f32 %v1280_v16, %v1276_v47  ;;  %v1308_v15 = vmul.f32 %v2502_v29, %v1196_v61  ;;  %v1312_v9 = vmul.f32 %v2505_v38, %v1200_v54 }
 0x298   : > { %v1228_v41 = vadd.f32 %v1224_v12, %v1220_v1  ;;  %v1260_v30 = vadd.f32 %v1256_v32, %v1252_v44  ;;  %v1316_v11 = vadd.f32 %v1304_v49, %v1300_v57  ;;  %v1189_v37 = vmul.f32 %v1185_v31, %v1181_v3 }
 0x299   : > { %v1292_v53 = vadd.f32 %v1288_v35, %v1284_v56  ;;  %v1320_v42 = vadd.f32 %v1312_v9, %v1308_v15  ;;  %v1193_v6 = vmul.f32 %v1181_v3, %v1145_v18  ;;  %v1197_v26 = vmul.f32 %v1185_v31, %v2429_v36  ;;  %v2528_v56 = vpop.permute.xlu0 %1132 }
 0x29a   : > { %v1232_v10 = vmul.f32 %v1228_v41, %v1164_v0  ;;  %v1264_v61 = vmul.f32 %v1260_v30, %v2439_v5  ;;  %v1201_v33 = vmul.f32 %v1145_v18, %v2429_v36  ;;  %v1205_v54 = vmul.f32 %v2478_v20, %v1189_v37 }
 0x29b   : > { %v1296_v16 = vmul.f32 %v1292_v53, %v1172_v43  ;;  %v1324_v4 = vadd.f32 %v1320_v42, %v1316_v11  ;;  %v1209_v7 = vmul.f32 %v2460_v45, %v1193_v6  ;;  %v1213_v2 = vmul.f32 %v2481_v50, %v1197_v26 }
 0x29c   : > { %v1332_v63 = vadd.f32 %v1264_v61, %v1232_v10  ;;  %v1217_v34 = vmul.f32 %v2466_v51, %v1201_v33  ;;  %v1237_v3 = vmul.f32 %v2484_v39, %v1189_v37  ;;  %v1241_v31 = vmul.f32 %v2463_v8, %v1193_v6 }
 0x29d   : > { %v1328_v0 = vmul.f32 %v1324_v4, %v2447_v17  ;;  %v1221_v5 = vadd.f32 %v1209_v7, %v1205_v54  ;;  %v1245_v36 = vmul.f32 %v2487_v27, %v1197_v26  ;;  %v1249_v18 = vmul.f32 %v2469_v14, %v1201_v33 }
 0x29e   : > { %v1225_v43 = vadd.f32 %v1217_v34, %v1213_v2  ;;  %v1253_v47 = vadd.f32 %v1241_v31, %v1237_v3  ;;  %v1269_v57 = vmul.f32 %v2490_v52, %v1189_v37  ;;  %v1273_v49 = vmul.f32 %v2472_v40, %v1193_v6 }
 0x29f   : > { %v1336_v1 = vadd.f32 %v1328_v0, %v1296_v16  ;;  %v1257_v12 = vadd.f32 %v1249_v18, %v1245_v36  ;;  %v1277_v44 = vmul.f32 %v2493_v48, %v1197_v26  ;;  %v1281_v32 = vmul.f32 %v2475_v58, %v1201_v33 }
 0x2a0   : > { %v1229_v17 = vadd.f32 %v1225_v43, %v1221_v5  ;;  %v1285_v35 = vadd.f32 %v1273_v49, %v1269_v57  ;;  %v1301_v15 = vmul.f32 %v2496_v21, %v1189_v37  ;;  %v1305_v9 = vmul.f32 %v2499_v19, %v1193_v6 }
 0x2a1   : > { %v1340_v41 = vadd.f32 %v1336_v1, %v1332_v63  ;;  %v1261_v30 = vadd.f32 %v1257_v12, %v1253_v47  ;;  %v1289_v11 = vadd.f32 %v1281_v32, %v1277_v44  ;;  %v1309_v53 = vmul.f32 %v2502_v29, %v1197_v26 }
 0x2a2   : > { %v1233_v42 = vmul.f32 %v1229_v17, %v2455_v23  ;;  %v1313_v10 = vmul.f32 %v2505_v38, %v1201_v33  ;;  %v1317_v61 = vadd.f32 %v1305_v9, %v1301_v15  ;;  %v1146_v54 = vrot.slane %v2528_v56, 1 }
 0x2a3   : > { %v1344_v16 = vmax.f32 %v1340_v41, 0.0  ;;  %v1265_v4 = vmul.f32 %v1261_v30, %v2452_v55  ;;  %v1293_v7 = vadd.f32 %v1289_v11, %v1285_v35  ;;  %v1162_v37 = vsub.f32 1.0, %v2528_v56  ;;  %v2541_v23 = vpop.permute.xlu1 %1134 }
 0x2a4   : > { %v1177_v6 = vmul.f32 %v2441_v13, %v2386_v24  ;;  %v1321_v2 = vadd.f32 %v1313_v10, %v1309_v53  ;;  %v1186_v63 = vsub.f32 1.0, %v1146_v54  ;;  %v1159_v26 = vsub.f32 1.0, %v2423_v46 }
 0x2a5   : > { %v1348_v33 = vmin.f32 %v1344_v16, 1.0  ;;  %v1297_v34 = vmul.f32 %v1293_v7, %v2458_v22  ;;  %v1333_v3 = vadd.f32 %v1265_v4, %v1233_v42  ;;  %v1170_v55 = vmul.f32 %v1158_v28, %v2528_v56 }
 0x2a6   : > { %v1325_v31 = vadd.f32 %v1321_v2, %v1317_v61  ;;  %v1166_v0 = vmul.f32 %v1162_v37, %v1158_v28  ;;  %v1190_v24 = vmul.f32 %v1186_v63, %v1182_v62  ;;  %v1194_v13 = vmul.f32 %v1182_v62, %v1146_v54 }
 0x2a7   : > { %1352 = vst [vmem:[%s1851_s3] sm:$0xff] %v1348_v33  ;;  %v1198_v5 = vmul.f32 %v1186_v63, %v2432_v59  ;;  %v1202_v22 = vmul.f32 %v1146_v54, %v2432_v59  ;;  %v1147_v36 = vrot.slane %v2541_v23, 1  ;;  %v1163_v18 = vsub.f32 1.0, %v2541_v23 }
 0x2a8   : > { %v1329_v43 = vmul.f32 %v1325_v31, %v1177_v6  ;;  %v1206_v47 = vmul.f32 %v2478_v20, %v1190_v24  ;;  %v1210_v28 = vmul.f32 %v2460_v45, %v1194_v13  ;;  %v1238_v57 = vmul.f32 %v2484_v39, %v1190_v24 }
 0x2a9   : > { %v1214_v49 = vmul.f32 %v2481_v50, %v1198_v5  ;;  %v1218_v62 = vmul.f32 %v2466_v51, %v1202_v22  ;;  %v1242_v1 = vmul.f32 %v2463_v8, %v1194_v13  ;;  %v1246_v12 = vmul.f32 %v2487_v27, %v1198_v5 }
 0x2aa   : > { %v1337_v59 = vadd.f32 %v1329_v43, %v1297_v34  ;;  %v1222_v44 = vadd.f32 %v1210_v28, %v1206_v47  ;;  %v1250_v32 = vmul.f32 %v2469_v14, %v1202_v22  ;;  %v1270_v17 = vmul.f32 %v2490_v52, %v1190_v24 }
 0x2ab   : > { %v1226_v35 = vadd.f32 %v1218_v62, %v1214_v49  ;;  %v1254_v15 = vadd.f32 %v1242_v1, %v1238_v57  ;;  %v1274_v9 = vmul.f32 %v2472_v40, %v1194_v13  ;;  %v1278_v41 = vmul.f32 %v2493_v48, %v1198_v5 }
 0x2ac   : > { %v1341_v30 = vadd.f32 %v1337_v59, %v1333_v3  ;;  %v1258_v11 = vadd.f32 %v1250_v32, %v1246_v12  ;;  %v1282_v53 = vmul.f32 %v2475_v58, %v1202_v22  ;;  %v1302_v42 = vmul.f32 %v2496_v21, %v1190_v24 }
 0x2ad   : > { %v1230_v10 = vadd.f32 %v1226_v35, %v1222_v44  ;;  %v1286_v61 = vadd.f32 %v1274_v9, %v1270_v17  ;;  %v1306_v54 = vmul.f32 %v2499_v19, %v1194_v13  ;;  %v1310_v16 = vmul.f32 %v2502_v29, %v1198_v5 }
 0x2ae   : > { %v1345_v4 = vmax.f32 %v1341_v30, 0.0  ;;  %v1262_v7 = vadd.f32 %v1258_v11, %v1254_v15  ;;  %v1290_v6 = vadd.f32 %v1282_v53, %v1278_v41  ;;  %v1314_v2 = vmul.f32 %v2505_v38, %v1202_v22 }
 0x2af   : > { %v1174_v63 = vmul.f32 %v1162_v37, %v2417_v25  ;;  %v1234_v33 = vmul.f32 %v1230_v10, %v1166_v0  ;;  %v1318_v34 = vadd.f32 %v1306_v54, %v1302_v42  ;;  %v1183_v3 = vsub.f32 1.0, %v2444_v60 }
 0x2b0   : > { %v1349_v31 = vmin.f32 %v1345_v4, 1.0  ;;  %v1266_v24 = vmul.f32 %v1262_v7, %v1170_v55  ;;  %v1294_v43 = vadd.f32 %v1290_v6, %v1286_v61  ;;  %v1322_v47 = vadd.f32 %v1314_v2, %v1310_v16 }
 0x2b1   : > { %v1178_v13 = vmul.f32 %v2528_v56, %v2417_v25  ;;  %v1167_v5 = vmul.f32 %v1163_v18, %v1159_v26  ;;  %v1187_v28 = vsub.f32 1.0, %v1147_v36  ;;  %v1195_v22 = vmul.f32 %v1183_v3, %v1147_v36 }
 0x2b2   : > { %1353 = vst [vmem:[%s1851_s3 + $0x8] sm:$0xff] %v1349_v31  ;;  %v1298_v37 = vmul.f32 %v1294_v43, %v1174_v63  ;;  %v1326_v0 = vadd.f32 %v1322_v47, %v1318_v34  ;;  %v1334_v57 = vadd.f32 %v1266_v24, %v1234_v33  ;;  %v1203_v49 = vmul.f32 %v1147_v36, %v2444_v60 }
 0x2b3   : > { %v1191_v62 = vmul.f32 %v1187_v28, %v1183_v3  ;;  %v1199_v55 = vmul.f32 %v1187_v28, %v2444_v60  ;;  %v1211_v1 = vmul.f32 %v2460_v45, %v1195_v22  ;;  %v1243_v25 = vmul.f32 %v2463_v8, %v1195_v22 }
 0x2b4   : > { %v1330_v56 = vmul.f32 %v1326_v0, %v1178_v13  ;;  %v1219_v12 = vmul.f32 %v2466_v51, %v1203_v49  ;;  %v1251_v59 = vmul.f32 %v2469_v14, %v1203_v49  ;;  %v1275_v44 = vmul.f32 %v2472_v40, %v1195_v22 }
 0x2b5   : > { %v1207_v32 = vmul.f32 %v2478_v20, %v1191_v62  ;;  %v1215_v17 = vmul.f32 %v2481_v50, %v1199_v55  ;;  %v1239_v36 = vmul.f32 %v2484_v39, %v1191_v62  ;;  %v1247_v35 = vmul.f32 %v2487_v27, %v1199_v55 }
 0x2b6   : > { %v1338_v60 = vadd.f32 %v1330_v56, %v1298_v37  ;;  %v1271_v45 = vmul.f32 %v2490_v52, %v1191_v62  ;;  %v1279_v8 = vmul.f32 %v2493_v48, %v1199_v55  ;;  %v1283_v15 = vmul.f32 %v2475_v58, %v1203_v49 }
 0x2b7   : > { %v1223_v51 = vadd.f32 %v1211_v1, %v1207_v32  ;;  %v1227_v9 = vadd.f32 %v1219_v12, %v1215_v17  ;;  %v1255_v14 = vadd.f32 %v1243_v25, %v1239_v36  ;;  %v1259_v41 = vadd.f32 %v1251_v59, %v1247_v35 }
 0x2b8   : > { %v1342_v40 = vadd.f32 %v1338_v60, %v1334_v57  ;;  %v1287_v30 = vadd.f32 %v1275_v44, %v1271_v45  ;;  %v1291_v20 = vadd.f32 %v1283_v15, %v1279_v8  ;;  %v1303_v50 = vmul.f32 %v2496_v21, %v1191_v62 }
 0x2b9   : > { %v1231_v39 = vadd.f32 %v1227_v9, %v1223_v51  ;;  %v1263_v11 = vadd.f32 %v1259_v41, %v1255_v14  ;;  %v1307_v27 = vmul.f32 %v2499_v19, %v1195_v22  ;;  %v1311_v52 = vmul.f32 %v2502_v29, %v1199_v55 }
 0x2ba   : > { %v1346_v53 = vmax.f32 %v1342_v40, 0.0  ;;  %v1171_v58 = vmul.f32 %v1159_v26, %v2541_v23  ;;  %v1295_v48 = vadd.f32 %v1291_v20, %v1287_v30  ;;  %v1315_v42 = vmul.f32 %v2505_v38, %v1203_v49 }
 0x2bb   : > { %v1175_v21 = vmul.f32 %v1163_v18, %v2423_v46  ;;  %v1319_v10 = vadd.f32 %v1307_v27, %v1303_v50  ;;  %v1235_v54 = vmul.f32 %v1231_v39, %v1167_v5  ;;  %v1179_v26 = vmul.f32 %v2541_v23, %v2423_v46 }
 0x2bc   : > { %v1350_v61 = vmin.f32 %v1346_v53, 1.0  ;;  %v1267_v19 = vmul.f32 %v1263_v11, %v1171_v58  ;;  %v1323_v29 = vadd.f32 %v1315_v42, %v1311_v52 }
 0x2bd   : > { %v1299_v16 = vmul.f32 %v1295_v48, %v1175_v21 }
 0x2be   : > { %1354 = vst [vmem:[%s1851_s3 + $0x10] sm:$0xff] %v1350_v61  ;;  %v1327_v4 = vadd.f32 %v1323_v29, %v1319_v10  ;;  %v1335_v7 = vadd.f32 %v1267_v19, %v1235_v54 }
 0x2c0   : > { %v1331_v38 = vmul.f32 %v1327_v4, %v1179_v26 }
 0x2c2   : > { %v1339_v6 = vadd.f32 %v1331_v38, %v1299_v16 }
 0x2c4   : > { %v1343_v2 = vadd.f32 %v1339_v6, %v1335_v7 }
 0x2c6   : > { %v1347_v18 = vmax.f32 %v1343_v2, 0.0 }
 0x2c8   : > { %v1351_v46 = vmin.f32 %v1347_v18, 1.0 }
 0x2ca   : > { %1355 = vst [vmem:[%s1851_s3 + $0x18] sm:$0xff] %v1351_v46 }
 0x2cb   : > { %1668 = shalt.err (!%p1665_p3)
}
 0x2cc   : > { %s1669_s5 = scalar_lea.hbm %s2615_s23, 512  ;;  %s1673_s28 = scalar_lea.hbm %s2663_s2, 1024 }
 0x2cd   : > { %p1670_p6 = scmp.ne.s32.totalorder %s2615_s23, %s1669_s5  ;;  %p1674_p13 = scmp.lt.s32.totalorder %s2615_s23, %s2663_s2 }
 0x2ce   : > { %p1675_p4 = scmp.lt.s32.totalorder %s1673_s28, %s1669_s5 }
 0x2cf   : > { %p1671_p11 = pnand %p1670_p6, %p2745_p8 }
 0x2d0   : > { %p1676_p5 = por %p1675_p4, %p1674_p13 }
 0x2d1   : > { %p1672_p12 = pneg %p1671_p11 }
 0x2d3   : > { %p1677_p7 = pnand %p1676_p5, %p1672_p12 }
 0x2d5   : > { %1680 = shalt.err (!%p1677_p7)
}
 0x2d6   : > { %s1729_s7 = smov 128   ;;  %s1730_s8 = smov 8  }
 0x2d7   : > { %1461 = dma.vmem_to_hbm [thread:$0]  (%p2745_p8), %s2617_s16, 512, %s2615_s23, %s1357_s24, %s1729_s7, %s1729_s7, %s1730_s8  }
 0x2d8 PF: > { %s1385_s20 = sand.u32 1, %s1709_s9   ;;  %p2746_p10 = scmp.ne.s32.totalorder %s2703_s22, 0 }
 0x2d9   : > { %p2747_p0 = scmp.ge.s32.totalorder %s1721_s12, 2  ;;  %s1386_s14 = scalar_lea.sflag [#allocation5], %s1385_s20 }
 0x2db   : > { %p1468_p2 = pnand %p2747_p0, %p2746_p10 }
 0x2dd   : > { %p1469_p9 = pneg %p1468_p2 }
 0x2df   : > { %1704 = dma.done.wait (%p1469_p9), %s1386_s14, 512  }
 0x2e0   : > { %1706 = vsyncadd (%p1469_p9), %s1386_s14, 4294966784  ;;  %p15_p1 = scmp.ge.s32.totalorder %s1771_s15, 4   ;;  %s2748_s9 = smov %s1713_s10 }
 0x2e1   : > { %s2749_s10 = smov %s1717_s11  ;;  %s2750_s11 = smov %s1783_s18 }
 0x2e2   : > { %s2751_s12 = smov %s1771_s15  ;;  %17 = sbr.rel (!%p15_p1) target bundleno = 5 (0x5), region = 75 }
 0x2e7   :  { %1391 = vsyncpa [#allocation4], 1 }
 0x2e8   :  { %1393 = vsyncpa [#allocation4 + $0x1], 1 }
 0x2e9   :  { %1394 = vsyncpa [#allocation5], 1 }
 0x2ea   :  { %1396 = vsyncpa [#allocation5 + $0x1], 1 }

</bundles_post_ra>
